<compile_context>
chip_gen: v7x
topology: tpu7x:2x2x1
jax: 0.10.0
libtpu: 0.0.40
codegen_flags: <defaults>
</compile_context>

<pallas_src>
import functools

import numpy as np
import jax
import jax.numpy as jnp
from jax.experimental import pallas as pl
from jax.experimental.pallas import tpu as pltpu


# ----------------------------------------------------------------------------
# Fused Pallas kernel: conv1 + ReLU -> conv2 + ReLU -> heads -> channel concat
# ----------------------------------------------------------------------------
def _fused_alpr_kernel(x_ref, sel_ref, w1_ref, w2_ref, wh_ref, b_ref, o_ref,
                       *, oh1, ow1, oh2, ow2, c1, c2):
    cin = x_ref.shape[-1]
    m1 = oh1 * ow1

    # merged biases (f32): [b1 | b2 | bhead]
    b = b_ref[...]
    b1 = b[:, 0:c1]
    b2 = b[:, c1:c1 + c2]
    bh = b[:, c1 + c2:c1 + c2 + 8]

    # ---- conv1 (3x3, stride 2, pad 1) + bias + ReLU -------------------------
    # x_ref is the phase-split padded input for one image: (4, Hp/2, Wp/2, Cin)
    # with leading index = (row parity)*2 + (col parity).  Every 3x3/stride-2
    # tap is then a static contiguous slice -> no strided loads, no HBM im2col.
    taps1 = []
    for kh in range(3):
        for kw in range(3):
            phase = (kh % 2) * 2 + (kw % 2)
            taps1.append(
                x_ref[phase, kh // 2:kh // 2 + oh1, kw // 2:kw // 2 + ow1, :])
    p1 = jnp.concatenate(taps1, axis=-1).reshape(m1, 9 * cin)     # (m1, 9*Cin) bf16
    y1 = jnp.dot(p1, w1_ref[...], preferred_element_type=jnp.float32)
    y1 = jnp.maximum(y1 + b1, 0.0).astype(jnp.bfloat16)           # (m1, C1)

    # ---- conv2 (3x3, stride 2, pad 1) + bias + ReLU -------------------------
    # y1 stays VMEM-resident; its stride-2 3x3 patches (incl. the zero padding)
    # are gathered with constant 0/1 selection matmuls, then one K=9*C1 GEMM.
    taps2 = []
    for t in range(9):
        g = jnp.dot(sel_ref[t], y1, preferred_element_type=jnp.float32)
        taps2.append(g.astype(jnp.bfloat16))                      # (m2, C1)
    p2 = jnp.concatenate(taps2, axis=-1)                          # (m2, 9*C1) bf16
    feat = jnp.dot(p2, w2_ref[...], preferred_element_type=jnp.float32)
    feat = jnp.maximum(feat + b2, 0.0).astype(jnp.bfloat16)       # (m2, C2)

    # ---- fused heads + channel concat (torch.cat((o1, o2), dim=1)) ----------
    # Head weights are pre-concatenated host-side -> single (C2, 8) GEMM.
    out = jnp.dot(feat, wh_ref[...], preferred_element_type=jnp.float32) + bh
    o_ref[0, :, :] = out.astype(o_ref.dtype)


# ----------------------------------------------------------------------------
# Host-side helpers (data layout only; no heavy compute outside the kernel)
# ----------------------------------------------------------------------------
def _phase_split(x_nhwc, pad=1):
    """Pad and split the input by (row, col) parity: (N*4, Hp/2, Wp/2, C)."""
    n, h, w, c = x_nhwc.shape
    xp = jnp.pad(x_nhwc, ((0, 0), (pad, pad), (pad, pad), (0, 0)))
    hp, wp = h + 2 * pad, w + 2 * pad
    assert hp % 2 == 0 and wp % 2 == 0, "even spatial dims expected"
    xp = xp.reshape(n, hp // 2, 2, wp // 2, 2, c)
    xp = jnp.transpose(xp, (0, 2, 4, 1, 3, 5))   # (n, pr, pc, hp/2, wp/2, c)
    return xp.reshape(n * 4, hp // 2, wp // 2, c)


def _conv2_selection(oh1, ow1, oh2, ow2, stride=2, pad=1):
    """Constant 0/1 matrices: sel[t] @ y1 == conv2 tap t patches (with padding)."""
    sel = np.zeros((9, oh2 * ow2, oh1 * ow1), np.float32)
    for kh in range(3):
        for kw in range(3):
            t = kh * 3 + kw
            for oh in range(oh2):
                for ow in range(ow2):
                    ih = oh * stride + kh - pad
                    iw = ow * stride + kw - pad
                    if 0 <= ih < oh1 and 0 <= iw < ow1:
                        sel[t, oh * ow2 + ow, ih * ow1 + iw] = 1.0
    return jnp.asarray(sel, jnp.bfloat16)


def _conv_w_to_gemm(w_oihw):
    """PyTorch (Cout, Cin, KH, KW) -> GEMM (KH*KW*Cin, Cout)."""
    cout = w_oihw.shape[0]
    return jnp.transpose(w_oihw, (2, 3, 1, 0)).reshape(-1, cout)


def init_params(key, cin=3, hidden=32, scale=1.0):
    c = int(hidden * scale)
    ks = jax.random.split(key, 8)
    s = 0.1
    return {
        # conv1: 3x3 stride 2 pad 1, cin -> c
        "w1": _conv_w_to_gemm(s * jax.random.normal(ks[0], (c, cin, 3, 3), jnp.float32)),
        "b1": s * jax.random.normal(ks[1], (1, c), jnp.float32),
        # conv2: 3x3 stride 2 pad 1, c -> c
        "w2": _conv_w_to_gemm(s * jax.random.normal(ks[2], (c, c, 3, 3), jnp.float32)),
        "b2": s * jax.random.normal(ks[3], (1, c), jnp.float32),
        # head 1 (probs, 2 channels): 1x1 conv == matmul
        "wp": s * jax.random.normal(ks[4], (c, 2), jnp.float32),
        "bp": s * jax.random.normal(ks[5], (1, 2), jnp.float32),
        # head 2 (affine / bbox, 6 channels): 1x1 conv == matmul
        "wb": s * jax.random.normal(ks[6], (c, 6), jnp.float32),
        "bb": s * jax.random.normal(ks[7], (1, 6), jnp.float32),
    }


def fused_alpr_forward(params, x_nchw):
    """Equivalent of FusedAlprModel.forward: cat(model(x), dim=1) in NCHW."""
    n, cin, h, w = x_nchw.shape
    oh1, ow1 = (h + 2 - 3) // 2 + 1, (w + 2 - 3) // 2 + 1
    oh2, ow2 = (oh1 + 2 - 3) // 2 + 1, (ow1 + 2 - 3) // 2 + 1
    hp2, wp2 = (h + 2) // 2, (w + 2) // 2
    m1, m2 = oh1 * ow1, oh2 * ow2
    c1 = params["w1"].shape[1]
    c2 = params["w2"].shape[1]

    # Layout plumbing only (no 9x im2col expansion in HBM).
    x = jnp.transpose(x_nchw, (0, 2, 3, 1)).astype(jnp.bfloat16)    # NHWC, bf16
    x_phase = _phase_split(x)                                       # (n*4, hp2, wp2, cin)

    sel = _conv2_selection(oh1, ow1, oh2, ow2)
    w1 = params["w1"].astype(jnp.bfloat16)
    w2 = params["w2"].astype(jnp.bfloat16)
    wh = jnp.concatenate([params["wp"], params["wb"]], axis=1).astype(jnp.bfloat16)
    # merged f32 biases: [b1 | b2 | bhead]  -> single tiny operand
    bias = jnp.concatenate(
        [params["b1"], params["b2"], params["bp"], params["bb"]], axis=1)

    kernel = functools.partial(_fused_alpr_kernel, oh1=oh1, ow1=ow1,
                               oh2=oh2, ow2=ow2, c1=c1, c2=c2)
    out = pl.pallas_call(
        kernel,
        out_shape=jax.ShapeDtypeStruct((n, m2, 8), jnp.float32),
        grid=(n,),
        in_specs=[
            pl.BlockSpec((4, hp2, wp2, cin), lambda i: (i, 0, 0, 0)),   # per-image phases
            pl.BlockSpec((9, m2, m1), lambda i: (0, 0, 0)),             # conv2 gather (const)
            pl.BlockSpec((9 * cin, c1), lambda i: (0, 0)),              # w1
            pl.BlockSpec((9 * c1, c2), lambda i: (0, 0)),               # w2
            pl.BlockSpec((c2, 8), lambda i: (0, 0)),                    # heads weight (concat)
            pl.BlockSpec((1, c1 + c2 + 8), lambda i: (0, 0)),           # merged biases
        ],
        out_specs=pl.BlockSpec((1, m2, 8), lambda i: (i, 0, 0)),
        compiler_params=pltpu.CompilerParams(
            dimension_semantics=("parallel",),          # dual-TC sharding on v7x
            vmem_limit_bytes=32 * 1024 * 1024,          # safe on v5e/v6e/v7x
        ),
    )(x_phase, sel, w1, w2, wh, bias)

    out = out.reshape(n, oh2, ow2, 8)
    return jnp.transpose(out, (0, 3, 1, 2))             # NCHW: (N, 2+6, OH, OW)


# ----------------------------------------------------------------------------
# Pure-XLA reference (independent im2col path, same bf16/f32 cast discipline)
# ----------------------------------------------------------------------------
def _im2col(x_nhwc, k, stride, pad):
    xp = jnp.pad(x_nhwc, ((0, 0), (pad, pad), (pad, pad), (0, 0)))
    _, hp, wp, _ = xp.shape
    oh = (hp - k) // stride + 1
    ow = (wp - k) // stride + 1
    cols = []
    for i in range(k):
        for j in range(k):
            cols.append(xp[:, i:i + stride * oh:stride, j:j + stride * ow:stride, :])
    return jnp.concatenate(cols, axis=-1), oh, ow


def reference_forward(params, x_nchw):
    x = jnp.transpose(x_nchw, (0, 2, 3, 1)).astype(jnp.bfloat16)
    n = x.shape[0]
    p1, oh1, ow1 = _im2col(x, 3, 2, 1)
    y1 = jnp.dot(p1.reshape(n * oh1 * ow1, -1), params["w1"].astype(jnp.bfloat16),
                 preferred_element_type=jnp.float32) + params["b1"]
    y1 = jnp.maximum(y1, 0.0).astype(jnp.bfloat16).reshape(n, oh1, ow1, -1)
    p2, oh2, ow2 = _im2col(y1, 3, 2, 1)
    y2 = jnp.dot(p2.reshape(n * oh2 * ow2, -1), params["w2"].astype(jnp.bfloat16),
                 preferred_element_type=jnp.float32) + params["b2"]
    feat = jnp.maximum(y2, 0.0).astype(jnp.bfloat16)
    wh = jnp.concatenate([params["wp"], params["wb"]], axis=1).astype(jnp.bfloat16)
    bh = jnp.concatenate([params["bp"], params["bb"]], axis=1)
    out = jnp.dot(feat, wh, preferred_element_type=jnp.float32) + bh
    out = out.reshape(n, oh2, ow2, 8)
    return jnp.transpose(out, (0, 3, 1, 2))


if __name__ == "__main__":
    key = jax.random.PRNGKey(0)
    pkey, xkey = jax.random.split(key)

    params = init_params(pkey, cin=3, hidden=32, scale=1.0)
    x = jax.random.normal(xkey, (2, 3, 16, 16), jnp.float32)   # NCHW like PyTorch

    fused = jax.jit(fused_alpr_forward)(params, x)
    fused = jax.block_until_ready(fused)

    assert fused.shape == (2, 8, 4, 4), fused.shape
    assert fused.dtype == jnp.float32
    assert bool(jnp.all(jnp.isfinite(fused)))

    ref = jax.block_until_ready(jax.jit(reference_forward)(params, x))
    assert bool(jnp.allclose(fused, ref, atol=1e-2, rtol=1e-2)), \
        float(jnp.max(jnp.abs(fused - ref)))

    print("KERNEL_OK")
</pallas_src>

<mosaic_0001>
module attributes {stable_mosaic.version = 11 : i64} {
  func.func @_fused_alpr_kernel(%arg0: i32, %arg1: memref<4x9x9x3xbf16, #tpu.memory_space<vmem>>, %arg2: memref<9x16x64xbf16, #tpu.memory_space<vmem>>, %arg3: memref<27x32xbf16, #tpu.memory_space<vmem>>, %arg4: memref<288x32xbf16, #tpu.memory_space<vmem>>, %arg5: memref<32x8xbf16, #tpu.memory_space<vmem>>, %arg6: memref<1x72xf32, #tpu.memory_space<vmem>>, %arg7: memref<1x16x8xf32, #tpu.memory_space<vmem>>) attributes {dimension_semantics = [#tpu.dimension_semantics<parallel>], iteration_bounds = array<i64: 2>, scalar_prefetch = 0 : i64, scratch_operands = 0 : i64, tpu.core_type = #tpu.core_type<tc>, window_params = [{transform_indices = @transform_0, window_bounds = array<i64: 4, 9, 9, 3>}, {pipeline_mode = #tpu.pipeline_mode<synchronous>, transform_indices = @transform_1, window_bounds = array<i64: 9, 16, 64>}, {pipeline_mode = #tpu.pipeline_mode<synchronous>, transform_indices = @transform_2, window_bounds = array<i64: 27, 32>}, {pipeline_mode = #tpu.pipeline_mode<synchronous>, transform_indices = @transform_3, window_bounds = array<i64: 288, 32>}, {pipeline_mode = #tpu.pipeline_mode<synchronous>, transform_indices = @transform_4, window_bounds = array<i64: 32, 8>}, {pipeline_mode = #tpu.pipeline_mode<synchronous>, transform_indices = @transform_5, window_bounds = array<i64: 1, 72>}, {transform_indices = @transform_6, window_bounds = array<i64: 1, 16, 8>}]} {
    %c0 = arith.constant 0 : index
    %c0_0 = arith.constant 0 : index
    %0 = vector.load %arg6[%c0, %c0_0] : memref<1x72xf32, #tpu.memory_space<vmem>>, vector<1x72xf32>
    %1 = vector.extract_strided_slice %0 {offsets = [0, 0], sizes = [1, 32], strides = [1, 1]} : vector<1x72xf32> to vector<1x32xf32>
    %2 = vector.extract_strided_slice %0 {offsets = [0, 32], sizes = [1, 32], strides = [1, 1]} : vector<1x72xf32> to vector<1x32xf32>
    %3 = vector.extract_strided_slice %0 {offsets = [0, 64], sizes = [1, 8], strides = [1, 1]} : vector<1x72xf32> to vector<1x8xf32>
    %c0_1 = arith.constant 0 : index
    %c0_2 = arith.constant 0 : index
    %c0_3 = arith.constant 0 : index
    %c0_4 = arith.constant 0 : index
    %4 = vector.load %arg1[%c0_1, %c0_2, %c0_3, %c0_4] : memref<4x9x9x3xbf16, #tpu.memory_space<vmem>>, vector<1x8x8x3xbf16>
    %5 = vector.shape_cast %4 : vector<1x8x8x3xbf16> to vector<8x8x3xbf16>
    %c1 = arith.constant 1 : index
    %c0_5 = arith.constant 0 : index
    %c0_6 = arith.constant 0 : index
    %c0_7 = arith.constant 0 : index
    %6 = vector.load %arg1[%c1, %c0_5, %c0_6, %c0_7] : memref<4x9x9x3xbf16, #tpu.memory_space<vmem>>, vector<1x8x8x3xbf16>
    %7 = vector.shape_cast %6 : vector<1x8x8x3xbf16> to vector<8x8x3xbf16>
    %c0_8 = arith.constant 0 : index
    %c0_9 = arith.constant 0 : index
    %c1_10 = arith.constant 1 : index
    %c0_11 = arith.constant 0 : index
    %8 = vector.load %arg1[%c0_8, %c0_9, %c1_10, %c0_11] : memref<4x9x9x3xbf16, #tpu.memory_space<vmem>>, vector<1x8x8x3xbf16>
    %9 = vector.shape_cast %8 : vector<1x8x8x3xbf16> to vector<8x8x3xbf16>
    %c2 = arith.constant 2 : index
    %c0_12 = arith.constant 0 : index
    %c0_13 = arith.constant 0 : index
    %c0_14 = arith.constant 0 : index
    %10 = vector.load %arg1[%c2, %c0_12, %c0_13, %c0_14] : memref<4x9x9x3xbf16, #tpu.memory_space<vmem>>, vector<1x8x8x3xbf16>
    %11 = vector.shape_cast %10 : vector<1x8x8x3xbf16> to vector<8x8x3xbf16>
    %c3 = arith.constant 3 : index
    %c0_15 = arith.constant 0 : index
    %c0_16 = arith.constant 0 : index
    %c0_17 = arith.constant 0 : index
    %12 = vector.load %arg1[%c3, %c0_15, %c0_16, %c0_17] : memref<4x9x9x3xbf16, #tpu.memory_space<vmem>>, vector<1x8x8x3xbf16>
    %13 = vector.shape_cast %12 : vector<1x8x8x3xbf16> to vector<8x8x3xbf16>
    %c2_18 = arith.constant 2 : index
    %c0_19 = arith.constant 0 : index
    %c1_20 = arith.constant 1 : index
    %c0_21 = arith.constant 0 : index
    %14 = vector.load %arg1[%c2_18, %c0_19, %c1_20, %c0_21] : memref<4x9x9x3xbf16, #tpu.memory_space<vmem>>, vector<1x8x8x3xbf16>
    %15 = vector.shape_cast %14 : vector<1x8x8x3xbf16> to vector<8x8x3xbf16>
    %c0_22 = arith.constant 0 : index
    %c1_23 = arith.constant 1 : index
    %c0_24 = arith.constant 0 : index
    %c0_25 = arith.constant 0 : index
    %16 = vector.load %arg1[%c0_22, %c1_23, %c0_24, %c0_25] : memref<4x9x9x3xbf16, #tpu.memory_space<vmem>>, vector<1x8x8x3xbf16>
    %17 = vector.shape_cast %16 : vector<1x8x8x3xbf16> to vector<8x8x3xbf16>
    %c1_26 = arith.constant 1 : index
    %c1_27 = arith.constant 1 : index
    %c0_28 = arith.constant 0 : index
    %c0_29 = arith.constant 0 : index
    %18 = vector.load %arg1[%c1_26, %c1_27, %c0_28, %c0_29] : memref<4x9x9x3xbf16, #tpu.memory_space<vmem>>, vector<1x8x8x3xbf16>
    %19 = vector.shape_cast %18 : vector<1x8x8x3xbf16> to vector<8x8x3xbf16>
    %c0_30 = arith.constant 0 : index
    %c1_31 = arith.constant 1 : index
    %c1_32 = arith.constant 1 : index
    %c0_33 = arith.constant 0 : index
    %20 = vector.load %arg1[%c0_30, %c1_31, %c1_32, %c0_33] : memref<4x9x9x3xbf16, #tpu.memory_space<vmem>>, vector<1x8x8x3xbf16>
    %21 = vector.shape_cast %20 : vector<1x8x8x3xbf16> to vector<8x8x3xbf16>
    %22 = tpu.concatenate %5, %7, %9, %11, %13, %15, %17, %19, %21 in 2 : vector<8x8x3xbf16>, vector<8x8x3xbf16>, vector<8x8x3xbf16>, vector<8x8x3xbf16>, vector<8x8x3xbf16>, vector<8x8x3xbf16>, vector<8x8x3xbf16>, vector<8x8x3xbf16>, vector<8x8x3xbf16> -> vector<8x8x27xbf16>
    %23 = vector.shape_cast %22 : vector<8x8x27xbf16> to vector<64x27xbf16>
    %c0_34 = arith.constant 0 : index
    %c0_35 = arith.constant 0 : index
    %24 = vector.load %arg3[%c0_34, %c0_35] : memref<27x32xbf16, #tpu.memory_space<vmem>>, vector<27x32xbf16>
    %cst = arith.constant dense<0.000000e+00> : vector<64x32xf32>
    %25 = tpu.matmul %23, %24, %cst {dimension_numbers = #tpu.dot_dimension_numbers<[1], [0], [0], [1], [0, 0, 1, 1], [], []>} : vector<64x27xbf16>, vector<27x32xbf16>, vector<64x32xf32> -> vector<64x32xf32>
    %26 = vector.broadcast %1 : vector<1x32xf32> to vector<64x32xf32>
    %27 = arith.addf %25, %26 : vector<64x32xf32>
    %cst_36 = arith.constant 0.000000e+00 : f32
    %28 = vector.broadcast %cst_36 : f32 to vector<64x32xf32>
    %29 = arith.maximumf %27, %28 : vector<64x32xf32>
    %30 = arith.truncf %29 : vector<64x32xf32> to vector<64x32xbf16>
    %c0_37 = arith.constant 0 : index
    %c0_38 = arith.constant 0 : index
    %c0_39 = arith.constant 0 : index
    %31 = vector.load %arg2[%c0_37, %c0_38, %c0_39] : memref<9x16x64xbf16, #tpu.memory_space<vmem>>, vector<1x16x64xbf16>
    %32 = vector.shape_cast %31 : vector<1x16x64xbf16> to vector<16x64xbf16>
    %cst_40 = arith.constant dense<0.000000e+00> : vector<16x32xf32>
    %33 = tpu.matmul %32, %30, %cst_40 {dimension_numbers = #tpu.dot_dimension_numbers<[1], [0], [0], [1], [0, 0, 1, 1], [], []>} : vector<16x64xbf16>, vector<64x32xbf16>, vector<16x32xf32> -> vector<16x32xf32>
    %34 = arith.truncf %33 : vector<16x32xf32> to vector<16x32xbf16>
    %c1_41 = arith.constant 1 : index
    %c0_42 = arith.constant 0 : index
    %c0_43 = arith.constant 0 : index
    %35 = vector.load %arg2[%c1_41, %c0_42, %c0_43] : memref<9x16x64xbf16, #tpu.memory_space<vmem>>, vector<1x16x64xbf16>
    %36 = vector.shape_cast %35 : vector<1x16x64xbf16> to vector<16x64xbf16>
    %cst_44 = arith.constant dense<0.000000e+00> : vector<16x32xf32>
    %37 = tpu.matmul %36, %30, %cst_44 {dimension_numbers = #tpu.dot_dimension_numbers<[1], [0], [0], [1], [0, 0, 1, 1], [], []>} : vector<16x64xbf16>, vector<64x32xbf16>, vector<16x32xf32> -> vector<16x32xf32>
    %38 = arith.truncf %37 : vector<16x32xf32> to vector<16x32xbf16>
    %c2_45 = arith.constant 2 : index
    %c0_46 = arith.constant 0 : index
    %c0_47 = arith.constant 0 : index
    %39 = vector.load %arg2[%c2_45, %c0_46, %c0_47] : memref<9x16x64xbf16, #tpu.memory_space<vmem>>, vector<1x16x64xbf16>
    %40 = vector.shape_cast %39 : vector<1x16x64xbf16> to vector<16x64xbf16>
    %cst_48 = arith.constant dense<0.000000e+00> : vector<16x32xf32>
    %41 = tpu.matmul %40, %30, %cst_48 {dimension_numbers = #tpu.dot_dimension_numbers<[1], [0], [0], [1], [0, 0, 1, 1], [], []>} : vector<16x64xbf16>, vector<64x32xbf16>, vector<16x32xf32> -> vector<16x32xf32>
    %42 = arith.truncf %41 : vector<16x32xf32> to vector<16x32xbf16>
    %c3_49 = arith.constant 3 : index
    %c0_50 = arith.constant 0 : index
    %c0_51 = arith.constant 0 : index
    %43 = vector.load %arg2[%c3_49, %c0_50, %c0_51] : memref<9x16x64xbf16, #tpu.memory_space<vmem>>, vector<1x16x64xbf16>
    %44 = vector.shape_cast %43 : vector<1x16x64xbf16> to vector<16x64xbf16>
    %cst_52 = arith.constant dense<0.000000e+00> : vector<16x32xf32>
    %45 = tpu.matmul %44, %30, %cst_52 {dimension_numbers = #tpu.dot_dimension_numbers<[1], [0], [0], [1], [0, 0, 1, 1], [], []>} : vector<16x64xbf16>, vector<64x32xbf16>, vector<16x32xf32> -> vector<16x32xf32>
    %46 = arith.truncf %45 : vector<16x32xf32> to vector<16x32xbf16>
    %c4 = arith.constant 4 : index
    %c0_53 = arith.constant 0 : index
    %c0_54 = arith.constant 0 : index
    %47 = vector.load %arg2[%c4, %c0_53, %c0_54] : memref<9x16x64xbf16, #tpu.memory_space<vmem>>, vector<1x16x64xbf16>
    %48 = vector.shape_cast %47 : vector<1x16x64xbf16> to vector<16x64xbf16>
    %cst_55 = arith.constant dense<0.000000e+00> : vector<16x32xf32>
    %49 = tpu.matmul %48, %30, %cst_55 {dimension_numbers = #tpu.dot_dimension_numbers<[1], [0], [0], [1], [0, 0, 1, 1], [], []>} : vector<16x64xbf16>, vector<64x32xbf16>, vector<16x32xf32> -> vector<16x32xf32>
    %50 = arith.truncf %49 : vector<16x32xf32> to vector<16x32xbf16>
    %c5 = arith.constant 5 : index
    %c0_56 = arith.constant 0 : index
    %c0_57 = arith.constant 0 : index
    %51 = vector.load %arg2[%c5, %c0_56, %c0_57] : memref<9x16x64xbf16, #tpu.memory_space<vmem>>, vector<1x16x64xbf16>
    %52 = vector.shape_cast %51 : vector<1x16x64xbf16> to vector<16x64xbf16>
    %cst_58 = arith.constant dense<0.000000e+00> : vector<16x32xf32>
    %53 = tpu.matmul %52, %30, %cst_58 {dimension_numbers = #tpu.dot_dimension_numbers<[1], [0], [0], [1], [0, 0, 1, 1], [], []>} : vector<16x64xbf16>, vector<64x32xbf16>, vector<16x32xf32> -> vector<16x32xf32>
    %54 = arith.truncf %53 : vector<16x32xf32> to vector<16x32xbf16>
    %c6 = arith.constant 6 : index
    %c0_59 = arith.constant 0 : index
    %c0_60 = arith.constant 0 : index
    %55 = vector.load %arg2[%c6, %c0_59, %c0_60] : memref<9x16x64xbf16, #tpu.memory_space<vmem>>, vector<1x16x64xbf16>
    %56 = vector.shape_cast %55 : vector<1x16x64xbf16> to vector<16x64xbf16>
    %cst_61 = arith.constant dense<0.000000e+00> : vector<16x32xf32>
    %57 = tpu.matmul %56, %30, %cst_61 {dimension_numbers = #tpu.dot_dimension_numbers<[1], [0], [0], [1], [0, 0, 1, 1], [], []>} : vector<16x64xbf16>, vector<64x32xbf16>, vector<16x32xf32> -> vector<16x32xf32>
    %58 = arith.truncf %57 : vector<16x32xf32> to vector<16x32xbf16>
    %c7 = arith.constant 7 : index
    %c0_62 = arith.constant 0 : index
    %c0_63 = arith.constant 0 : index
    %59 = vector.load %arg2[%c7, %c0_62, %c0_63] : memref<9x16x64xbf16, #tpu.memory_space<vmem>>, vector<1x16x64xbf16>
    %60 = vector.shape_cast %59 : vector<1x16x64xbf16> to vector<16x64xbf16>
    %cst_64 = arith.constant dense<0.000000e+00> : vector<16x32xf32>
    %61 = tpu.matmul %60, %30, %cst_64 {dimension_numbers = #tpu.dot_dimension_numbers<[1], [0], [0], [1], [0, 0, 1, 1], [], []>} : vector<16x64xbf16>, vector<64x32xbf16>, vector<16x32xf32> -> vector<16x32xf32>
    %62 = arith.truncf %61 : vector<16x32xf32> to vector<16x32xbf16>
    %c8 = arith.constant 8 : index
    %c0_65 = arith.constant 0 : index
    %c0_66 = arith.constant 0 : index
    %63 = vector.load %arg2[%c8, %c0_65, %c0_66] : memref<9x16x64xbf16, #tpu.memory_space<vmem>>, vector<1x16x64xbf16>
    %64 = vector.shape_cast %63 : vector<1x16x64xbf16> to vector<16x64xbf16>
    %cst_67 = arith.constant dense<0.000000e+00> : vector<16x32xf32>
    %65 = tpu.matmul %64, %30, %cst_67 {dimension_numbers = #tpu.dot_dimension_numbers<[1], [0], [0], [1], [0, 0, 1, 1], [], []>} : vector<16x64xbf16>, vector<64x32xbf16>, vector<16x32xf32> -> vector<16x32xf32>
    %66 = arith.truncf %65 : vector<16x32xf32> to vector<16x32xbf16>
    %67 = tpu.concatenate %34, %38, %42, %46, %50, %54, %58, %62, %66 in 1 : vector<16x32xbf16>, vector<16x32xbf16>, vector<16x32xbf16>, vector<16x32xbf16>, vector<16x32xbf16>, vector<16x32xbf16>, vector<16x32xbf16>, vector<16x32xbf16>, vector<16x32xbf16> -> vector<16x288xbf16>
    %c0_68 = arith.constant 0 : index
    %c0_69 = arith.constant 0 : index
    %68 = vector.load %arg4[%c0_68, %c0_69] : memref<288x32xbf16, #tpu.memory_space<vmem>>, vector<288x32xbf16>
    %cst_70 = arith.constant dense<0.000000e+00> : vector<16x32xf32>
    %69 = tpu.matmul %67, %68, %cst_70 {dimension_numbers = #tpu.dot_dimension_numbers<[1], [0], [0], [1], [0, 0, 1, 1], [], []>} : vector<16x288xbf16>, vector<288x32xbf16>, vector<16x32xf32> -> vector<16x32xf32>
    %70 = vector.broadcast %2 : vector<1x32xf32> to vector<16x32xf32>
    %71 = arith.addf %69, %70 : vector<16x32xf32>
    %cst_71 = arith.constant 0.000000e+00 : f32
    %72 = vector.broadcast %cst_71 : f32 to vector<16x32xf32>
    %73 = arith.maximumf %71, %72 : vector<16x32xf32>
    %74 = arith.truncf %73 : vector<16x32xf32> to vector<16x32xbf16>
    %c0_72 = arith.constant 0 : index
    %c0_73 = arith.constant 0 : index
    %75 = vector.load %arg5[%c0_72, %c0_73] : memref<32x8xbf16, #tpu.memory_space<vmem>>, vector<32x8xbf16>
    %cst_74 = arith.constant dense<0.000000e+00> : vector<16x8xf32>
    %76 = tpu.matmul %74, %75, %cst_74 {dimension_numbers = #tpu.dot_dimension_numbers<[1], [0], [0], [1], [0, 0, 1, 1], [], []>} : vector<16x32xbf16>, vector<32x8xbf16>, vector<16x8xf32> -> vector<16x8xf32>
    %77 = vector.broadcast %3 : vector<1x8xf32> to vector<16x8xf32>
    %78 = arith.addf %76, %77 : vector<16x8xf32>
    %c0_75 = arith.constant 0 : index
    %c0_76 = arith.constant 0 : index
    %c0_77 = arith.constant 0 : index
    %79 = vector.load %arg7[%c0_75, %c0_76, %c0_77] : memref<1x16x8xf32, #tpu.memory_space<vmem>>, vector<1x16x8xf32>
    %80 = vector.shape_cast %79 : vector<1x16x8xf32> to vector<16x8xf32>
    %81 = vector.shape_cast %78 : vector<16x8xf32> to vector<1x16x8xf32>
    tpu.vector_store %arg7[%c0_75, %c0_76, %c0_77], %81 {strides = array<i32>} : memref<1x16x8xf32, #tpu.memory_space<vmem>>, vector<1x16x8xf32>,
    return
  }
  func.func @transform_0(%arg0: i32) -> (i32, i32, i32, i32) {
    %c0_i32 = arith.constant 0 : i32
    %c0_i32_0 = arith.constant 0 : i32
    %c0_i32_1 = arith.constant 0 : i32
    %c0_i32_2 = arith.constant 0 : i32
    return %arg0, %c0_i32, %c0_i32_0, %c0_i32_1 : i32, i32, i32, i32
  }
  func.func @transform_1(%arg0: i32) -> (i32, i32, i32) {
    %c0_i32 = arith.constant 0 : i32
    %c0_i32_0 = arith.constant 0 : i32
    %c0_i32_1 = arith.constant 0 : i32
    %c0_i32_2 = arith.constant 0 : i32
    return %c0_i32, %c0_i32_0, %c0_i32_1 : i32, i32, i32
  }
  func.func @transform_2(%arg0: i32) -> (i32, i32) {
    %c0_i32 = arith.constant 0 : i32
    %c0_i32_0 = arith.constant 0 : i32
    %c0_i32_1 = arith.constant 0 : i32
    return %c0_i32, %c0_i32_0 : i32, i32
  }
  func.func @transform_3(%arg0: i32) -> (i32, i32) {
    %c0_i32 = arith.constant 0 : i32
    %c0_i32_0 = arith.constant 0 : i32
    %c0_i32_1 = arith.constant 0 : i32
    return %c0_i32, %c0_i32_0 : i32, i32
  }
  func.func @transform_4(%arg0: i32) -> (i32, i32) {
    %c0_i32 = arith.constant 0 : i32
    %c0_i32_0 = arith.constant 0 : i32
    %c0_i32_1 = arith.constant 0 : i32
    return %c0_i32, %c0_i32_0 : i32, i32
  }
  func.func @transform_5(%arg0: i32) -> (i32, i32) {
    %c0_i32 = arith.constant 0 : i32
    %c0_i32_0 = arith.constant 0 : i32
    %c0_i32_1 = arith.constant 0 : i32
    return %c0_i32, %c0_i32_0 : i32, i32
  }
  func.func @transform_6(%arg0: i32) -> (i32, i32, i32) {
    %c0_i32 = arith.constant 0 : i32
    %c0_i32_0 = arith.constant 0 : i32
    %c0_i32_1 = arith.constant 0 : i32
    return %arg0, %c0_i32, %c0_i32_0 : i32, i32, i32
  }
}

</mosaic_0001>

<bundles_post_ra>
// kernel: fused_alpr_forward.1
= control target key start
LH: loop header
LB: loop body
LE: loop exit
PB: predicated region body
PF: predicated region fallthrough
CT: control target
= control target key end

     0   :  { %11 = vsyncpa [#allocation3], 0  ;;  %s3285_s0 = inlined_call_operand.vmem [shape: bf16[8,9,9,3], index: 0, kind: input, shape index: {}]   ;;  %s3286_s1 = inlined_call_operand.vmem [shape: bf16[9,16,64], index: 1, kind: input, shape index: {}]   ;;  %s3287_s2 = inlined_call_operand.vmem [shape: bf16[27,32], index: 2, kind: input, shape index: {}]   ;;  %s3288_s3 = inlined_call_operand.vmem [shape: bf16[288,32], index: 3, kind: input, shape index: {}]   ;;  %s3289_s4 = inlined_call_operand.vmem [shape: bf16[32,8], index: 4, kind: input, shape index: {}]   ;;  %s3290_s5 = inlined_call_operand.vmem [shape: f32[1,72], index: 5, kind: input, shape index: {}]   ;;  %s3291_s6 = inlined_call_operand.hbm [shape: f32[2,16,8], index: 6, kind: output, shape index: {}]  }
   0x1   :  { %13 = vsyncpa [#allocation3 + $0x1], 0  ;;  %s2692_s21 = smov 0   ;;  %s2694_s22 = smov 0  }
   0x2   :  { %s2696_s23 = smov 0   ;;  %s2698_s24 = smov 0  }
   0x3 LB: > { %s2713_s25 = sadd.s32 4294967295, %s2638_s24   ;;  %s2010_s26 = sadd.s32 4294967294, %s2638_s24   ;;  %s2638_s24 = sphi %s2698_s24, %s3297_s24   ;;  %s2634_s23 = sphi %s2696_s23, %s3296_s23   ;;  %s2630_s22 = sphi %s2694_s22, %s3295_s22   ;;  %s2626_s21 = sphi %s2692_s21, %s3294_s21  }
   0x4   : > { %s2717_s27 = sadd.s32 1, %s2638_s24   ;;  %s157_s28 = sadd.s32 1, %s2634_s23 }
   0x5   : > { %s154_s29 = ssub.s32 %s2638_s24, %s2717_s27  ;;  %p167_p0 = scmp.ne.s32.totalorder %s2634_s23, %s2630_s22 }
   0x6   : > { %p155_p1 = scmp.eq.s32.totalorder %s154_s29, 0  ;;  %p168_p2 = scmp.eq.s32.totalorder %s2713_s25, 1 }
   0x7   : > { %p173_p3 = scmp.ne.s32.totalorder %s2630_s22, %s2626_s21  ;;  %p174_p4 = scmp.eq.s32.totalorder %s2010_s26, 1 }
   0x8   : > { %s2728_s30 = scalar_select %p155_p1, %s2634_s23, %s157_s28  }
   0x9   : > { %p2730_p5 = por %p168_p2, %p167_p0  ;;  %p2734_p6 = por %p174_p4, %p173_p3 }
   0xa   : > { %p2013_p7 = scmp.ge.s32.totalorder %s2638_s24, 1  ;;  %p217_p8 = scmp.lt.s32.totalorder %s2638_s24, 3 }
   0xc   : > { %p218_p9 = pnand %p2013_p7, %p217_p8 }
   0xd   : > { %s2015_s9 = sshll.u32 (!%p218_p9), %s2713_s25, 2  ;;  %s2640_s14 = smov (!%p218_p9), 3   ;;  %vm1036_vm0 = vcmask (!%p218_p9), 1044480   ;;  %vm1037_vm1 = vcmask (!%p218_p9), 1045504   ;;  %vm838_vm2 = vcmask (!%p218_p9), 23552   ;;  %vm863_vm3 = vcmask (!%p218_p9), 48128  }
   0xe   : > { %221 = sbr.rel (%p218_p9) target bundleno = 1337 (0x539), region = 44  ;;  %p249_p10 = scmp.lt.s32.totalorder (!%p218_p9), %s2015_s9, 7  ;;  %vm880_vm4 = vcmask (!%p218_p9), 72704   ;;  %vm897_vm5 = vcmask (!%p218_p9), 97280   ;;  %vm914_vm6 = vcmask (!%p218_p9), 121856   ;;  %vm931_vm7 = vcmask (!%p218_p9), 146432  }
   0xf   : > { %s2641_s15 = smov (!%p218_p9), 9   ;;  %s2642_s16 = smov (!%p218_p9), 6   ;;  %vm948_vm8 = vcmask (!%p218_p9), 171008   ;;  %vm965_vm9 = vcmask (!%p218_p9), 195584   ;;  %vm1023_vm10 = vcmask (!%p218_p9), 220160   ;;  %vm2650_vm11 = vmmov (!%p218_p9), 0  }
  0x10   : > { %s2643_s17 = smov (!%p218_p9), 12   ;;  %s2644_s18 = smov (!%p218_p9), 15   ;;  %vm1127_vm12 = vcmask (!%p218_p9), 523264   ;;  %vm1615_vm13 = vcmask (!%p218_p9), 261120   ;;  %vm1621_vm14 = vcmask (!%p218_p9), 785408   ;;  %vm1931_vm15 = vcmask (!%p218_p9), 64512  }
  0x11   : > { %s2645_s19 = smov (!%p218_p9), 18   ;;  %s2653_s28 = smov (!%p218_p9), 96  }
  0x12   : > { %s2209_s26 = sshll.u32 (!%p218_p9), %s2713_s25, 8  ;;  %s2654_s12 = smov (!%p218_p9), [#allocation2]  }
  0x15   : > { %s3299_s9 = smov (!%p249_p10, %s2015_s9), 7 }
  0x16   : > { %s2425_s10 = smul.u32 72, %s3299_s9  ;;  %s2646_s9 = smov 21  }
  0x18   : > { %s2744_s13 = scalar_lea.vmem %s3285_s0, %s2425_s10  ;;  %s2648_s10 = smov 24  }
  0x19   : > { %v2481_v0 = vld [vmem:[%s2744_s13 + $0x58] ss:$0 sps:$4 sm:$0xff]   ;;  %v2482_v1 = vld [vmem:[%s2744_s13 + $0x48] ss:$0 sps:$4 sm:$0xff]   ;;  %v2483_v2 = vld [vmem:[%s2744_s13 + $0x60] ss:$0 sps:$4 sm:$0xff]  }
  0x1a   : > { %362 = vrot.lane.b32.xlu1 %v2481_v0, %s2640_s14  ;;  %358 = vrot.lane.b32.xlu0 %v2482_v1, %s2640_s14  ;;  %v2484_v3 = vld [vmem:[%s2744_s13 + $0x50] ss:$0 sps:$4 sm:$0xff]   ;;  %v2026_v4 = vld [vmem:[%s2744_s13 + $0x98] sm:$0xf] }
  0x1b   : > { %v2025_v5 = vld [vmem:[%s2744_s13 + $0x90] sm:$0xf]  ;;  %v2755_v6 = vld [vmem:[%s2744_s13 + $0x8] sm:$0xf]  ;;  %v275_v7 = vld [vmem:[%s2744_s13 + $0xc] sm:$0x1]  ;;  %v2090_v13 = vcombine.low %v2026_v4, %v2026_v4 }
  0x1c   : > { %v2759_v8 = vld [vmem:[%s2744_s13] sm:$0xf]  ;;  %v2082_v9 = vcombine.low %v2755_v6, %v275_v7  ;;  %v274_v10 = vld [vmem:[%s2744_s13 + $0x4] sm:$0x1]  ;;  %v2764_v11 = vld [vmem:[%s2744_s13 + $0x18] sm:$0xf]  ;;  %v2089_v18 = vcombine.low %v2025_v5, %v2025_v5 }
  0x1d   : > { %v277_v12 = vld [vmem:[%s2744_s13 + $0x1c] sm:$0x1]  ;;  %v2081_v14 = vcombine.low %v2759_v8, %v274_v10  ;;  %v2771_v16 = vld [vmem:[%s2744_s13 + $0x10] sm:$0xf]  ;;  %v276_v17 = vld [vmem:[%s2744_s13 + $0x14] sm:$0x1] }
  0x1e   : > { %364 = vrot.lane.b32.xlu1 %v2483_v2, %s2640_s14  ;;  %v2084_v15 = vcombine.low %v2764_v11, %v277_v12  ;;  %360 = vrot.lane.b32.xlu0 %v2484_v3, %s2640_s14  ;;  %v422_v19 = vshrl.u32 %v2082_v9, 16  ;;  %v424_v20 = vshll.u32 %v2082_v9, 16  ;;  %v2083_v21 = vcombine.low %v2771_v16, %v276_v17  ;;  %v2042_v35 = vld [vmem:[%s2744_s13 + $0x9c] sm:$0x1]  ;;  %v2028_v37 = vld [vmem:[%s2744_s13 + $0xa8] sm:$0xf] }
  0x1f   : > { %v415_v22 = vshrl.u32 %v2081_v14, 16  ;;  %v417_v23 = vshll.u32 %v2081_v14, 16  ;;  %v2041_v38 = vld [vmem:[%s2744_s13 + $0x94] sm:$0x1]  ;;  %v2027_v39 = vld [vmem:[%s2744_s13 + $0xa0] sm:$0xf]  ;;  %v2106_v40 = vcombine.low %v2026_v4, %v2042_v35  ;;  %v2092_v41 = vcombine.low %v2028_v37, %v2028_v37 }
  0x20   : > { %v438_v24 = vshll.u32 %v2084_v15, 16  ;;  %v426_v25 = vrot.slane %v424_v20, 1  ;;  %v431_v26 = vshll.u32 %v2083_v21, 16  ;;  %v436_v28 = vshrl.u32 %v2084_v15, 16  ;;  %v2044_v43 = vld [vmem:[%s2744_s13 + $0xac] sm:$0x1] }
  0x21   : > { %v419_v27 = vrot.slane %v417_v23, 1  ;;  %v429_v31 = vshrl.u32 %v2083_v21, 16  ;;  %v2105_v42 = vcombine.low %v2025_v5, %v2041_v38  ;;  %v2091_v44 = vcombine.low %v2027_v39, %v2027_v39  ;;  %v2043_v45 = vld [vmem:[%s2744_s13 + $0xa4] sm:$0x1]  ;;  %v2497_v47 = vld [vmem:[%s2744_s13 + $0xe0] ss:$0 sps:$4 sm:$0xff]  }
  0x22   : > { %512 = vrot.lane.b32.xlu1 %v2090_v13, %s2641_s15  ;;  %v440_v29 = vrot.slane %v438_v24, 1  ;;  %510 = vrot.lane.b32.xlu0 %v2089_v18, %s2641_s15  ;;  %v427_v30 = vor.u32 %v426_v25, %v422_v19  ;;  %v433_v32 = vrot.slane %v431_v26, 1  ;;  %v2108_v46 = vcombine.low %v2028_v37, %v2044_v43  ;;  %v2498_v50 = vld [vmem:[%s2744_s13 + $0xd8] ss:$0 sps:$4 sm:$0xff]   ;;  %v2499_v52 = vld [vmem:[%s2744_s13 + $0xf0] ss:$0 sps:$4 sm:$0xff]  }
  0x23   : > { %v420_v33 = vor.u32 %v419_v27, %v415_v22  ;;  %v600_v48 = vshll.u32 %v2106_v40, 16  ;;  %v2107_v49 = vcombine.low %v2027_v39, %v2043_v45  ;;  %v593_v51 = vshll.u32 %v2105_v42, 16  ;;  %v2500_v56 = vld [vmem:[%s2744_s13 + $0xe8] ss:$0 sps:$4 sm:$0xff]   ;;  %v2066_v3 = vld [vmem:[%s2744_s13 + $0x14] sm:$0x1] }
  0x24   : > { %v441_v34 = vor.u32 %v440_v29, %v436_v28  ;;  %v434_v36 = vor.u32 %v433_v32, %v429_v31  ;;  %v598_v53 = vshrl.u32 %v2106_v40, 16  ;;  %v614_v55 = vshll.u32 %v2108_v46, 16  ;;  %v2050_v5 = vld [vmem:[%s2744_s13 + $0x10] sm:$0xf]  ;;  %v2065_v7 = vld [vmem:[%s2744_s13 + $0xc] sm:$0x1] }
  0x25   : > { %v602_v54 = vrot.slane %v600_v48, 1  ;;  %v591_v57 = vshrl.u32 %v2105_v42, 16  ;;  %v595_v58 = vrot.slane %v593_v51, 1  ;;  %v607_v59 = vshll.u32 %v2107_v49, 16  ;;  %v2049_v9 = vld [vmem:[%s2744_s13 + $0x8] sm:$0xf] }
  0x26   : > { %472 = vrot.lane.b32.xlu1 %v427_v30, %s2642_s16  ;;  %470 = vrot.lane.b32.xlu0 %v420_v33, %s2642_s16  ;;  %v612_v61 = vshrl.u32 %v2108_v46, 16  ;;  %v616_v62 = vrot.slane %v614_v55, 1  ;;  %v605_v0 = vshrl.u32 %v2107_v49, 16  ;;  %v2068_v10 = vld [vmem:[%s2744_s13 + $0x24] sm:$0x1]  ;;  %v2130_v12 = vcombine.low %v2050_v5, %v2066_v3 }
  0x27   : > { %v603_v60 = vor.u32 %v602_v54, %v598_v53  ;;  %v596_v63 = vor.u32 %v595_v58, %v591_v57  ;;  %v609_v1 = vrot.slane %v607_v59, 1  ;;  %v2114_v13 = vcombine.low %v2050_v5, %v2050_v5  ;;  %v2052_v15 = vld [vmem:[%s2744_s13 + $0x20] sm:$0xf]  ;;  %v2067_v19 = vld [vmem:[%s2744_s13 + $0x1c] sm:$0x1] }
  0x28   : > { %v617_v2 = vor.u32 %v616_v62, %v612_v61  ;;  %v2129_v14 = vcombine.low %v2049_v9, %v2065_v7  ;;  %v2113_v17 = vcombine.low %v2049_v9, %v2049_v9  ;;  %v2808_v18 = vcombine.low %v2052_v15, %v2068_v10  ;;  %v2051_v20 = vld [vmem:[%s2744_s13 + $0x18] sm:$0xf]  ;;  %v2817_v28 = vld [vmem:[%s2744_s13 + $0x28] sm:$0xf]  ;;  %v279_v29 = vld [vmem:[%s2744_s13 + $0x2c] sm:$0x1] }
  0x29   : > { %v610_v4 = vor.u32 %v609_v1, %v605_v0  ;;  %v776_v21 = vshll.u32 %v2130_v12, 16  ;;  %v2116_v22 = vcombine.low %v2052_v15, %v2052_v15  ;;  %v2131_v23 = vcombine.low %v2051_v20, %v2067_v19  ;;  %v2509_v27 = vld [vmem:[%s2744_s13 + $0x58] ss:$0 sps:$4 sm:$0xff]   ;;  %v2510_v30 = vld [vmem:[%s2744_s13 + $0x50] ss:$0 sps:$4 sm:$0xff]   ;;  %v2545_v38 = vld [vmem:[%s3287_s2] sm:$0xff]  }
  0x2a   : > { %476 = vrot.lane.b32.xlu1 %v441_v34, %s2642_s16  ;;  %474 = vrot.lane.b32.xlu0 %v434_v36, %s2642_s16  ;;  %v769_v24 = vshll.u32 %v2129_v14, 16  ;;  %v2115_v25 = vcombine.low %v2051_v20, %v2051_v20  ;;  %v790_v26 = vshll.u32 %v2808_v18, 16  ;;  %v774_v31 = vshrl.u32 %v2130_v12, 16  ;;  %v2511_v40 = vld [vmem:[%s2744_s13 + $0x68] ss:$0 sps:$4 sm:$0xff]  }
  0x2b   : > { %v778_v32 = vrot.slane %v776_v21, 1  ;;  %v767_v33 = vshrl.u32 %v2129_v14, 16  ;;  %v788_v35 = vshrl.u32 %v2808_v18, 16  ;;  %v781_v36 = vshrl.u32 %v2131_v23, 16  ;;  %2289 = vmatprep.subr.bf16.mxu0 %v2545_v38  ;;  %v2512_v42 = vld [vmem:[%s2744_s13 + $0x60] ss:$0 sps:$4 sm:$0xff]  }
  0x2c   : > { %v771_v34 = vrot.slane %v769_v24, 1  ;;  %v783_v37 = vshll.u32 %v2131_v23, 16  ;;  %v2086_v39 = vcombine.low %v2817_v28, %v279_v29  ;;  %2290 = vmatpush3.bf16.msra.mxu0 %v2545_v38  ;;  %v2546_v43 = vld [vmem:[%s3287_s2 + $0x8] sm:$0x3f]   ;;  %v2647_v45 = vmov 65535  }
  0x2d   : > { %v1038_v46 = vsel %vm1036_vm0, 4294967295, %v2647_v45  ;;  %v2837_v51 = vld [vmem:[%s2744_s13 + $0x20] sm:$0xf]  ;;  %v2513_v54 = vld [vmem:[%s2744_s13 + $0x70] ss:$0 sps:$4 sm:$0xff]  }
  0x2e   : > { %516 = vrot.lane.b32.xlu1 %v2092_v41, %s2641_s15  ;;  %514 = vrot.lane.b32.xlu0 %v2091_v44, %s2641_s15  ;;  %v792_v41 = vrot.slane %v790_v26, 1  ;;  %v785_v44 = vrot.slane %v783_v37, 1  ;;  %v1039_v48 = vsel %vm1037_vm1, %v1038_v46, 0  ;;  %v772_v53 = vor.u32 %v771_v34, %v767_v33  ;;  %v2514_v55 = vld [vmem:[%s2744_s13 + $0x68] ss:$0 sps:$4 sm:$0xff]  }
  0x2f   : > { %v1041_v49 = vand.u32 %v2546_v43, %v1039_v48  ;;  %v281_v57 = vld [vmem:[%s2744_s13 + $0x3c] sm:$0x1]  ;;  %v2849_v58 = vld [vmem:[%s2744_s13 + $0x30] sm:$0xf]  ;;  %v280_v59 = vld [vmem:[%s2744_s13 + $0x34] sm:$0x1] }
  0x30   : > { %v793_v61 = vor.u32 %v792_v41, %v788_v35  ;;  %v2087_v1 = vcombine.low %v2849_v58, %v280_v59  ;;  %v450_v3 = vshrl.u32 %v2086_v39, 16  ;;  %v2516_v7 = vld [vmem:[%s2744_s13 + $0x78] ss:$0 sps:$4 sm:$0xff]   ;;  %v2029_v23 = vld [vmem:[%s2744_s13 + $0xb0] sm:$0xf] }
  0x31   : > { %2291 = vmatprep.subr.bf16.mxu0 %v1041_v49  ;;  %v2093_v26 = vcombine.low %v2029_v23, %v2029_v23  ;;  %v2045_v29 = vld [vmem:[%s2744_s13 + $0xb4] sm:$0x1]  ;;  %v2048_v34 = vld [vmem:[%s2744_s13 + $0xcc] sm:$0x1]  ;;  %v2529_v38 = vld [vmem:[%s2744_s13 + $0x100] ss:$0 sps:$4 sm:$0xff]  }
  0x32   : > { %552 = vrot.lane.b32.xlu1 %v2497_v47, %s2643_s17  ;;  %550 = vrot.lane.b32.xlu0 %v2498_v50, %s2643_s17  ;;  %v452_v47 = vshll.u32 %v2086_v39, 16  ;;  %v779_v50 = vor.u32 %v778_v32, %v774_v31  ;;  %v459_v12 = vshll.u32 %v2087_v1, 16  ;;  %v457_v18 = vshrl.u32 %v2087_v1, 16  ;;  %v2530_v41 = vld [vmem:[%s2744_s13 + $0xf8] ss:$0 sps:$4 sm:$0xff]  }
  0x33   : > { %2292 = vmatpush3.bf16.msra.mxu0 %v1041_v49  ;;  %v2109_v33 = vcombine.low %v2029_v23, %v2045_v29  ;;  %v2531_v43 = vld [vmem:[%s2744_s13 + $0x110] ss:$0 sps:$4 sm:$0xff]   ;;  %v2070_v1 = vld [vmem:[%s2744_s13 + $0x34] sm:$0x1] }
  0x34   : > { %v461_v19 = vrot.slane %v459_v12, 1  ;;  %v2072_v12 = vld [vmem:[%s2744_s13 + $0x44] sm:$0x1] }
  0x35   : > { %v619_v48 = vshrl.u32 %v2109_v33, 16 }
  0x36   : > { %556 = vrot.lane.b32.xlu1 %v2499_v52, %s2643_s17  ;;  %554 = vrot.lane.b32.xlu0 %v2500_v56, %s2643_s17  ;;  %v278_v52 = vld [vmem:[%s2744_s13 + $0x24] sm:$0x1]  ;;  %v2844_v56 = vld [vmem:[%s2744_s13 + $0x38] sm:$0xf]  ;;  %v462_v21 = vor.u32 %v461_v19, %v457_v18 }
  0x37   : > { %v2088_v62 = vcombine.low %v2844_v56, %v281_v57 }
  0x39   : > { %v466_v5 = vshll.u32 %v2088_v62, 16  ;;  %v464_v14 = vshrl.u32 %v2088_v62, 16  ;;  %v2054_v62 = vld [vmem:[%s2744_s13 + $0x30] sm:$0xf] }
  0x3a   : > { %648 = vrot.lane.b32.xlu1 %v603_v60, %s2644_s18  ;;  %646 = vrot.lane.b32.xlu0 %v596_v63, %s2644_s18  ;;  %v2085_v60 = vcombine.low %v2837_v51, %v278_v52  ;;  %v786_v63 = vor.u32 %v785_v44, %v781_v36  ;;  %v2047_v36 = vld [vmem:[%s2744_s13 + $0xc4] sm:$0x1] }
  0x3b   : > { %v468_v15 = vrot.slane %v466_v5, 1  ;;  %v2055_v5 = vld [vmem:[%s2744_s13 + $0x38] sm:$0xf] }
  0x3c   : > { %v445_v0 = vshll.u32 %v2085_v60, 16  ;;  %v443_v9 = vshrl.u32 %v2085_v60, 16 }
  0x3d   : > { %v469_v20 = vor.u32 %v468_v15, %v464_v14  ;;  %v2071_v14 = vld [vmem:[%s2744_s13 + $0x3c] sm:$0x1] }
  0x3e   : > { %652 = vrot.lane.b32.xlu1 %v617_v2, %s2644_s18  ;;  %650 = vrot.lane.b32.xlu0 %v610_v4, %s2644_s18  ;;  %v2515_v2 = vld [vmem:[%s2744_s13 + $0x80] ss:$0 sps:$4 sm:$0xff]   ;;  %v454_v4 = vrot.slane %v452_v47, 1  ;;  %v447_v10 = vrot.slane %v445_v0, 1  ;;  %v2532_v47 = vld [vmem:[%s2744_s13 + $0x108] ss:$0 sps:$4 sm:$0xff]   ;;  %v2118_v0 = vcombine.low %v2054_v62, %v2054_v62  ;;  %v2135_v19 = vcombine.low %v2055_v5, %v2071_v14 }
  0x42   : > { %688 = vrot.lane.b32.xlu1 %v2114_v13, %s2645_s19  ;;  %686 = vrot.lane.b32.xlu0 %v2113_v17, %s2645_s19  ;;  %v455_v13 = vor.u32 %v454_v4, %v450_v3  ;;  %v448_v17 = vor.u32 %v447_v10, %v443_v9  ;;  %v2056_v3 = vld [vmem:[%s2744_s13 + $0x40] sm:$0xf]  ;;  %v2069_v4 = vld [vmem:[%s2744_s13 + $0x2c] sm:$0x1] }
  0x43   : > { %v2120_v9 = vcombine.low %v2056_v3, %v2056_v3  ;;  %v2136_v15 = vcombine.low %v2056_v3, %v2072_v12 }
  0x46   : > { %692 = vrot.lane.b32.xlu1 %v2116_v22, %s2645_s19  ;;  %690 = vrot.lane.b32.xlu0 %v2115_v25, %s2645_s19  ;;  %v2030_v22 = vld [vmem:[%s2744_s13 + $0xb8] sm:$0xf]  ;;  %v2046_v25 = vld [vmem:[%s2744_s13 + $0xbc] sm:$0x1] }
  0x47   : > { %v2094_v24 = vcombine.low %v2030_v22, %v2030_v22  ;;  %v2110_v31 = vcombine.low %v2030_v22, %v2046_v25  ;;  %v2543_v22 = vld [vmem:[%s2744_s13 + $0x88] ss:$0 sps:$4 sm:$0xff]   ;;  %v818_v25 = vshll.u32 %v2136_v15, 16 }
  0x49   : > { %v628_v39 = vshll.u32 %v2110_v31, 16  ;;  %v626_v44 = vshrl.u32 %v2110_v31, 16 }
  0x4a   : > { %728 = vrot.lane.b32.xlu1 %v2509_v27, %s2646_s9  ;;  %726 = vrot.lane.b32.xlu0 %v2510_v30, %s2646_s9  ;;  %v2032_v27 = vld [vmem:[%s2744_s13 + $0xc8] sm:$0xf]  ;;  %v2031_v30 = vld [vmem:[%s2744_s13 + $0xc0] sm:$0xf] }
  0x4b   : > { %v2096_v32 = vcombine.low %v2032_v27, %v2032_v27  ;;  %v2095_v35 = vcombine.low %v2031_v30, %v2031_v30  ;;  %v2112_v37 = vcombine.low %v2032_v27, %v2048_v34  ;;  %v630_v45 = vrot.slane %v628_v39, 1 }
  0x4c   : > { %v816_v34 = vshrl.u32 %v2136_v15, 16 }
  0x4d   : > { %v642_v46 = vshll.u32 %v2112_v37, 16  ;;  %v631_v52 = vor.u32 %v630_v45, %v626_v44 }
  0x4e   : > { %732 = vrot.lane.b32.xlu1 %v2511_v40, %s2646_s9  ;;  %730 = vrot.lane.b32.xlu0 %v2512_v42, %s2646_s9  ;;  %v2111_v40 = vcombine.low %v2031_v30, %v2047_v36  ;;  %v621_v42 = vshll.u32 %v2109_v33, 16  ;;  %v811_v30 = vshll.u32 %v2135_v19, 16 }
  0x50   : > { %v623_v49 = vrot.slane %v621_v42, 1  ;;  %v633_v57 = vshrl.u32 %v2111_v40, 16 }
  0x52   : > { %824 = vrot.lane.b32.xlu1 %v779_v50, %s2648_s10  ;;  %822 = vrot.lane.b32.xlu0 %v772_v53, %s2648_s10  ;;  %v635_v50 = vshll.u32 %v2111_v40, 16  ;;  %v640_v53 = vshrl.u32 %v2112_v37, 16  ;;  %v809_v37 = vshrl.u32 %v2135_v19, 16 }
  0x54   : > { %v637_v59 = vrot.slane %v635_v50, 1 }
  0x56   : > { %368 = vrot.lane.b32.xlu1 %v2513_v54, %s2640_s14  ;;  %366 = vrot.lane.b32.xlu0 %v2514_v55, %s2640_s14  ;;  %v644_v54 = vrot.slane %v642_v46, 1  ;;  %v624_v55 = vor.u32 %v623_v49, %v619_v48 }
  0x58   : > { %v645_v60 = vor.u32 %v644_v54, %v640_v53 }
  0x5a   : > { %828 = vrot.lane.b32.xlu1 %v793_v61, %s2648_s10  ;;  %826 = vrot.lane.b32.xlu0 %v786_v63, %s2648_s10  ;;  %v638_v61 = vor.u32 %v637_v59, %v633_v57  ;;  %v2053_v63 = vld [vmem:[%s2744_s13 + $0x28] sm:$0xf] }
  0x5b   : > { %v2133_v10 = vcombine.low %v2053_v63, %v2069_v4 }
  0x5d   : > { %v795_v27 = vshrl.u32 %v2133_v10, 16 }
  0x5e   : > { %372 = vrot.lane.b32.xlu1 %v2515_v2, %s2640_s14  ;;  %370 = vrot.lane.b32.xlu0 %v2516_v7, %s2640_s14  ;;  %v2117_v2 = vcombine.low %v2053_v63, %v2053_v63  ;;  %v2134_v7 = vcombine.low %v2054_v62, %v2070_v1  ;;  %s2652_s14 = smov 64  }
  0x60   : > { %v804_v18 = vshll.u32 %v2134_v7, 16  ;;  %v802_v23 = vshrl.u32 %v2134_v7, 16 }
  0x62   : > { %480 = vrot.lane.b32.xlu1 %v455_v13, %s2642_s16  ;;  %478 = vrot.lane.b32.xlu0 %v448_v17, %s2642_s16  ;;  %v2119_v13 = vcombine.low %v2055_v5, %v2055_v5  ;;  %v2541_v17 = vld [vmem:[%s2744_s13 + $0x78] ss:$0 sps:$4 sm:$0xff]  }
  0x66   : > { %484 = vrot.lane.b32.xlu1 %v469_v20, %s2642_s16  ;;  %482 = vrot.lane.b32.xlu0 %v462_v21, %s2642_s16  ;;  %v2542_v20 = vld [vmem:[%s2744_s13 + $0x70] ss:$0 sps:$4 sm:$0xff]   ;;  %v797_v21 = vshll.u32 %v2133_v10, 16  ;;  %s2651_s16 = smov 32  }
  0x68   : > { %v799_v29 = vrot.slane %v797_v21, 1 }
  0x6a   : > { %520 = vrot.lane.b32.xlu1 %v2094_v24, %s2641_s15  ;;  %518 = vrot.lane.b32.xlu0 %v2093_v26, %s2641_s15  ;;  %v806_v24 = vrot.slane %v804_v18, 1  ;;  %v2544_v26 = vld [vmem:[%s2744_s13 + $0x80] ss:$0 sps:$4 sm:$0xff]   ;;  %v800_v36 = vor.u32 %v799_v29, %v795_v27  ;;  %s2580_s13 = sshll.u32 %s2654_s12, 4  ;;  %s2581_s13 = int_to_ptr.vmem [resolvable:$false] %s2580_s13 }
  0x6c   : > { %v807_v33 = vor.u32 %v806_v24, %v802_v23 }
  0x6e   : > { %524 = vrot.lane.b32.xlu1 %v2096_v32, %s2641_s15  ;;  %522 = vrot.lane.b32.xlu0 %v2095_v35, %s2641_s15  ;;  %v820_v35 = vrot.slane %v818_v25, 1 }
  0x72   : > { %560 = vrot.lane.b32.xlu1 %v2529_v38, %s2643_s17  ;;  %558 = vrot.lane.b32.xlu0 %v2530_v41, %s2643_s17  ;;  %v813_v38 = vrot.slane %v811_v30, 1  ;;  %v821_v41 = vor.u32 %v820_v35, %v816_v34 }
  0x74   : > { %v814_v42 = vor.u32 %v813_v38, %v809_v37 }
  0x76   : > { %564 = vrot.lane.b32.xlu1 %v2531_v43, %s2643_s17  ;;  %562 = vrot.lane.b32.xlu0 %v2532_v47, %s2643_s17  ;;  %s245_s17 = sand.u32 1, %s2630_s22  }
  0x77   : > { %s3244_s25 = scalar_lea.sflag [#allocation3], %s245_s17 }
  0x7a   : > { %656 = vrot.lane.b32.xlu1 %v631_v52, %s2644_s18  ;;  %654 = vrot.lane.b32.xlu0 %v624_v55, %s2644_s18 }
  0x7e   : > { %660 = vrot.lane.b32.xlu1 %v645_v60, %s2644_s18  ;;  %658 = vrot.lane.b32.xlu0 %v638_v61, %s2644_s18  ;;  %s2014_s18 = sshll.u32 %s245_s17, 4 }
  0x82   : > { %696 = vrot.lane.b32.xlu1 %v2118_v0, %s2645_s19  ;;  %694 = vrot.lane.b32.xlu0 %v2117_v2, %s2645_s19 }
  0x86   : > { %700 = vrot.lane.b32.xlu1 %v2120_v9, %s2645_s19  ;;  %698 = vrot.lane.b32.xlu0 %v2119_v13, %s2645_s19  ;;  %s247_s19 = scalar_lea.vmem [#allocation2], %s2014_s18 }
  0x87   : > { %s1948_s20 = sshll.u32 %s247_s19, 4  ;;  %s3237_s20 = int_to_ptr.vmem [resolvable:$true] %s1948_s20 }
  0x88   : > { %s2576_s11 = scalar_lea.vmem %s3237_s20, 256  ;;  %p2583_p0 = scmp.lt.s32.totalorder %s3237_s20, %s2581_s13 }
  0x89   : > { %p2577_p11 = scmp.ne.s32.totalorder %s3237_s20, %s2576_s11 }
  0x8a   : > { %736 = vrot.lane.b32.xlu1 %v2541_v17, %s2646_s9  ;;  %734 = vrot.lane.b32.xlu0 %v2542_v20, %s2646_s9 }
  0x8b   : > { %p2578_p12 = pnand %p2577_p11, %p2730_p5 }
  0x8c   : > { %v2910_v31 = vpop.permute.xlu1 %362  ;;  %v359_v32 = vpop.permute.xlu0 %358 }
  0x8d   : > { %v841_v4 = vsel %vm838_vm2, %v2759_v8, %v359_v32  ;;  %v847_v27 = vsel %vm838_vm2, %v2771_v16, %v2910_v31  ;;  %p2579_p13 = pneg %p2578_p12 }
  0x8e   : > { %740 = vrot.lane.b32.xlu1 %v2543_v22, %s2646_s9  ;;  %738 = vrot.lane.b32.xlu0 %v2544_v26, %s2646_s9 }
  0x90   : > { %v365_v39 = vpop.permute.xlu1 %364  ;;  %v361_v40 = vpop.permute.xlu0 %360 }
  0x91   : > { %v844_v2 = vsel %vm838_vm2, %v2755_v6, %v361_v40  ;;  %v850_v25 = vsel %vm838_vm2, %v2764_v11, %v365_v39 }
  0x92   : > { %832 = vrot.lane.b32.xlu1 %v807_v33, %s2648_s10  ;;  %830 = vrot.lane.b32.xlu0 %v800_v36, %s2648_s10 }
  0x94   : > { %v513_v43 = vpop.permute.xlu1 %512  ;;  %v511_v44 = vpop.permute.xlu0 %510 }
  0x96   : > { %836 = vrot.lane.b32.xlu1 %v821_v41, %s2648_s10  ;;  %834 = vrot.lane.b32.xlu0 %v814_v42, %s2648_s10  ;;  %s3242_s10 = scalar_lea.hbm %s3291_s6, %s2209_s26 }
  0x98   : > { %v473_v45 = vpop.permute.xlu1 %472  ;;  %v471_v46 = vpop.permute.xlu0 %470 }
  0x99   : > { %v867_v5 = vsel %vm863_vm3, %v844_v2, %v473_v45  ;;  %v865_v9 = vsel %vm863_vm3, %v841_v4, %v471_v46 }
  0x9a   : > { %v884_v10 = vsel %vm880_vm4, %v867_v5, %v513_v43  ;;  %v882_v6 = vsel %vm880_vm4, %v865_v9, %v511_v44 }
  0x9c   : > { %v477_v47 = vpop.permute.xlu1 %476  ;;  %v475_v48 = vpop.permute.xlu0 %474 }
  0x9d   : > { %v871_v29 = vsel %vm863_vm3, %v850_v25, %v477_v47  ;;  %v869_v32 = vsel %vm863_vm3, %v847_v27, %v475_v48 }
  0xa0   : > { %v517_v49 = vpop.permute.xlu1 %516  ;;  %v515_v50 = vpop.permute.xlu0 %514 }
  0xa1   : > { %v888_v33 = vsel %vm880_vm4, %v871_v29, %v517_v49  ;;  %v886_v35 = vsel %vm880_vm4, %v869_v32, %v515_v50 }
  0xa4   : > { %v553_v52 = vpop.permute.xlu1 %552  ;;  %v551_v53 = vpop.permute.xlu0 %550 }
  0xa5   : > { %v901_v13 = vsel %vm897_vm5, %v884_v10, %v553_v52  ;;  %v899_v8 = vsel %vm897_vm5, %v882_v6, %v551_v53 }
  0xa8   : > { %v557_v54 = vpop.permute.xlu1 %556  ;;  %v555_v55 = vpop.permute.xlu0 %554 }
  0xa9   : > { %v905_v36 = vsel %vm897_vm5, %v888_v33, %v557_v54  ;;  %v903_v37 = vsel %vm897_vm5, %v886_v35, %v555_v55 }
  0xac   : > { %v649_v57 = vpop.permute.xlu1 %648  ;;  %v647_v59 = vpop.permute.xlu0 %646 }
  0xad   : > { %v918_v15 = vsel %vm914_vm6, %v901_v13, %v649_v57  ;;  %v916_v17 = vsel %vm914_vm6, %v899_v8, %v647_v59 }
  0xb0   : > { %v653_v60 = vpop.permute.xlu1 %652  ;;  %v651_v61 = vpop.permute.xlu0 %650 }
  0xb1   : > { %v922_v38 = vsel %vm914_vm6, %v905_v36, %v653_v60  ;;  %v920_v16 = vsel %vm914_vm6, %v903_v37, %v651_v61 }
  0xb4   : > { %v689_v62 = vpop.permute.xlu1 %688  ;;  %v687_v63 = vpop.permute.xlu0 %686 }
  0xb5   : > { %v935_v18 = vsel %vm931_vm7, %v918_v15, %v689_v62  ;;  %v933_v19 = vsel %vm931_vm7, %v916_v17, %v687_v63 }
  0xb8   : > { %v693_v0 = vpop.permute.xlu1 %692  ;;  %v691_v1 = vpop.permute.xlu0 %690 }
  0xb9   : > { %v939_v31 = vsel %vm931_vm7, %v922_v38, %v693_v0  ;;  %v937_v39 = vsel %vm931_vm7, %v920_v16, %v691_v1 }
  0xbc   : > { %v729_v3 = vpop.permute.xlu1 %728  ;;  %v727_v7 = vpop.permute.xlu0 %726 }
  0xbd   : > { %v952_v20 = vsel %vm948_vm8, %v935_v18, %v729_v3  ;;  %v950_v22 = vsel %vm948_vm8, %v933_v19, %v727_v7 }
  0xc0   : > { %v733_v12 = vpop.permute.xlu1 %732  ;;  %v731_v14 = vpop.permute.xlu0 %730 }
  0xc1   : > { %v956_v40 = vsel %vm948_vm8, %v939_v31, %v733_v12  ;;  %v954_v42 = vsel %vm948_vm8, %v937_v39, %v731_v14 }
  0xc4   : > { %v825_v21 = vpop.permute.xlu1 %824  ;;  %v823_v24 = vpop.permute.xlu0 %822 }
  0xc5   : > { %v969_v23 = vsel %vm965_vm9, %v952_v20, %v825_v21  ;;  %v967_v26 = vsel %vm965_vm9, %v950_v22, %v823_v24 }
  0xc6   : > { %v2138_v30 = vcombine.low %v967_v26, %v969_v23 }
  0xc8   : > { %v369_v34 = vpop.permute.xlu1 %368  ;;  %2293 = vmatprep.mubr.msk.bf16.mxu0 %vm1023_vm10, %v2138_v30  ;;  %v367_v11 = vpop.permute.xlu0 %366 }
  0xc9   : > { %v856_v13 = vsel %vm838_vm2, %v2817_v28, %v369_v34  ;;  %v853_v6 = vsel %vm838_vm2, %v2837_v51, %v367_v11 }
  0xcc   : > { %v829_v41 = vpop.permute.xlu1 %828  ;;  %v827_v44 = vpop.permute.xlu0 %826 }
  0xcd   : > { %v973_v43 = vsel %vm965_vm9, %v956_v40, %v829_v41  ;;  %v971_v45 = vsel %vm965_vm9, %v954_v42, %v827_v44 }
  0xce   : > { %v2139_v46 = vcombine.low %v971_v45, %v973_v43 }
  0xd0   : > { %v373_v47 = vpop.permute.xlu1 %372  ;;  %2294 = vmatmul.mubr.msk.bf16.vlgmr.msra.gmra.mrb[0].mxu0 %vm1023_vm10, %v2139_v46  ;;  %v371_v48 = vpop.permute.xlu0 %370 }
  0xd1   : > { %v862_v21 = vsel %vm838_vm2, %v2844_v56, %v373_v47  ;;  %v859_v51 = vsel %vm838_vm2, %v2849_v58, %v371_v48  ;;  %v2649_v47 = vmov 0.0   ;;  %v3004_v48 = vld [vmem:[%s3290_s5] ss:$0 sm:$0xff] }
  0xd2   : > { %2301 = vmatprep.subr.bf16.mxu1 %v2649_v47  ;;  %2313 = vmatprep.subr.bf16.mxu0 %v2649_v47 }
  0xd3   : > { %2309 = vmatprep.mubr.msk.bf16.mxu1 %vm2650_vm11, %v2649_v47 }
  0xd4   : > { %v481_v49 = vpop.permute.xlu1 %480  ;;  %v479_v50 = vpop.permute.xlu0 %478 }
  0xd5   : > { %v875_v14 = vsel %vm863_vm3, %v856_v13, %v481_v49  ;;  %v873_v8 = vsel %vm863_vm3, %v853_v6, %v479_v50 }
  0xd8   : > { %v485_v52 = vpop.permute.xlu1 %484  ;;  %v483_v53 = vpop.permute.xlu0 %482 }
  0xd9   : > { %v879_v23 = vsel %vm863_vm3, %v862_v21, %v485_v52  ;;  %v877_v26 = vsel %vm863_vm3, %v859_v51, %v483_v53  ;;  %v2550_v21 = vld [vmem:[%s3286_s1 + $0x18] sm:$0xff]   ;;  %v2553_v51 = vld [vmem:[%s3286_s1 + $0x30] sm:$0xff]  }
  0xdc   : > { %v521_v54 = vpop.permute.xlu1 %520  ;;  %v519_v55 = vpop.permute.xlu0 %518 }
  0xdd   : > { %v892_v15 = vsel %vm880_vm4, %v875_v14, %v521_v54  ;;  %v890_v18 = vsel %vm880_vm4, %v873_v8, %v519_v55 }
  0xe0   : > { %v525_v57 = vpop.permute.xlu1 %524  ;;  %v523_v59 = vpop.permute.xlu0 %522 }
  0xe1   : > { %v896_v27 = vsel %vm880_vm4, %v879_v23, %v525_v57  ;;  %v894_v32 = vsel %vm880_vm4, %v877_v26, %v523_v59  ;;  %v2554_v23 = vld [vmem:[%s3286_s1 + $0x38] sm:$0xff]  }
  0xe4   : > { %v561_v60 = vpop.permute.xlu1 %560  ;;  %v559_v61 = vpop.permute.xlu0 %558 }
  0xe5   : > { %v909_v19 = vsel %vm897_vm5, %v892_v15, %v561_v60  ;;  %v907_v28 = vsel %vm897_vm5, %v890_v18, %v559_v61  ;;  %v2547_v18 = vld [vmem:[%s3286_s1] sm:$0xff]  }
  0xe8   : > { %v565_v62 = vpop.permute.xlu1 %564  ;;  %v563_v63 = vpop.permute.xlu0 %562 }
  0xe9   : > { %v913_v33 = vsel %vm897_vm5, %v896_v27, %v565_v62  ;;  %v911_v36 = vsel %vm897_vm5, %v894_v32, %v563_v63 }
  0xec   : > { %v657_v0 = vpop.permute.xlu1 %656  ;;  %v655_v1 = vpop.permute.xlu0 %654 }
  0xed   : > { %v926_v22 = vsel %vm914_vm6, %v909_v19, %v657_v0  ;;  %v924_v24 = vsel %vm914_vm6, %v907_v28, %v655_v1  ;;  %v2548_v19 = vld [vmem:[%s3286_s1 + $0x8] sm:$0xff]   ;;  %v2551_v28 = vld [vmem:[%s3286_s1 + $0x20] sm:$0xff]  }
  0xf0   : > { %v661_v2 = vpop.permute.xlu1 %660  ;;  %v659_v3 = vpop.permute.xlu0 %658 }
  0xf1   : > { %v930_v11 = vsel %vm914_vm6, %v913_v33, %v661_v2  ;;  %v928_v38 = vsel %vm914_vm6, %v911_v36, %v659_v3  ;;  %v2557_v36 = vld [vmem:[%s3288_s3] sm:$0xff]  }
  0xf4   : > { %v697_v4 = vpop.permute.xlu1 %696  ;;  %v695_v5 = vpop.permute.xlu0 %694 }
  0xf5   : > { %v943_v25 = vsel %vm931_vm7, %v926_v22, %v697_v4  ;;  %v941_v29 = vsel %vm931_vm7, %v924_v24, %v695_v5  ;;  %v2552_v22 = vld [vmem:[%s3286_s1 + $0x28] sm:$0xff]   ;;  %v2555_v24 = vld [vmem:[%s3286_s1 + $0x40] sm:$0xff]  }
  0xf8   : > { %v701_v7 = vpop.permute.xlu1 %700  ;;  %v699_v9 = vpop.permute.xlu0 %698 }
  0xf9   : > { %v947_v16 = vsel %vm931_vm7, %v930_v11, %v701_v7  ;;  %v945_v39 = vsel %vm931_vm7, %v928_v38, %v699_v9  ;;  %v2558_v11 = vld [vmem:[%s3288_s3 + $0x48] sm:$0xff]  }
  0xfc   : > { %v737_v10 = vpop.permute.xlu1 %736  ;;  %v735_v12 = vpop.permute.xlu0 %734 }
  0xfd   : > { %v960_v56 = vsel %vm948_vm8, %v943_v25, %v737_v10  ;;  %v958_v58 = vsel %vm948_vm8, %v941_v29, %v735_v12 }
 0x100   : > { %v741_v17 = vpop.permute.xlu1 %740  ;;  %v739_v20 = vpop.permute.xlu0 %738 }
 0x101   : > { %v964_v40 = vsel %vm948_vm8, %v947_v16, %v741_v17  ;;  %v962_v42 = vsel %vm948_vm8, %v945_v39, %v739_v20  ;;  %v2549_v20 = vld [vmem:[%s3286_s1 + $0x10] sm:$0xff]  }
 0x104   : > { %v833_v30 = vpop.permute.xlu1 %832  ;;  %v831_v35 = vpop.permute.xlu0 %830 }
 0x105   : > { %v977_v34 = vsel %vm965_vm9, %v960_v56, %v833_v30  ;;  %v975_v37 = vsel %vm965_vm9, %v958_v58, %v831_v35  ;;  %v2556_v35 = vld [vmem:[%s3288_s3 + $0x40] sm:$0xff]  }
 0x106   : > { %v2140_v31 = vcombine.low %v975_v37, %v977_v34  ;;  %v2559_v37 = vld [vmem:[%s3288_s3 + $0x8] sm:$0xff]  }
 0x108   : > { %v837_v41 = vpop.permute.xlu1 %836  ;;  %2297 = vmatprep.mubr.msk.bf16.mxu0 %vm1023_vm10, %v2140_v31  ;;  %v835_v44 = vpop.permute.xlu0 %834  ;;  %v2560_v31 = vld [vmem:[%s3288_s3 + $0x50] sm:$0xff]  }
 0x109   : > { %v981_v43 = vsel %vm965_vm9, %v964_v40, %v837_v41  ;;  %v979_v45 = vsel %vm965_vm9, %v962_v42, %v835_v44 }
 0x10a   : > { %v2141_v46 = vcombine.low %v979_v45, %v981_v43 }
 0x10c   : > { %2298 = vmatmul.mubr.msk.bf16.gmra.mrb[4].mxu0 %vm1023_vm10, %v2141_v46 }
 0x10d   : > { %2321 = vmatprep.mubr.msk.bf16.mxu0 %vm2650_vm11, %v2649_v47 }
 0x1a3   : > { %v2295_v49 = vpop.f32.mrb[0].mxu0 }
 0x1a4   : > { %v1086_v50 = vadd.f32 %v2295_v49, %v3004_v48  ;;  %v1077_v52 = vpop.f32.mrb[1].mxu0  ;;  %v2561_v49 = vld [vmem:[%s3288_s3 + $0x10] sm:$0xff]  }
 0x1a5   : > { %v1078_v53 = vadd.f32 %v3004_v48, %v1077_v52  ;;  %v2296_v54 = vpop.f32.mrb[2].mxu0  ;;  %v2563_v52 = vld [vmem:[%s3288_s3 + $0x18] sm:$0xff]  }
 0x1a6   : > { %v1089_v55 = vadd.f32 %v2296_v54, %v3004_v48  ;;  %v1080_v57 = vpop.f32.mrb[3].mxu0  ;;  %v1110_v60 = vmax.f32 %v1086_v50, 0.0  ;;  %v2562_v50 = vld [vmem:[%s3288_s3 + $0x58] sm:$0xff]   ;;  %v2570_v54 = vld [vmem:[%s3288_s3 + $0x80] sm:$0xff]  }
 0x1a7   : > { %v1081_v59 = vadd.f32 %v3004_v48, %v1080_v57  ;;  %v1108_v62 = vmax.f32 %v1078_v53, 0.0  ;;  %v2564_v53 = vld [vmem:[%s3288_s3 + $0x60] sm:$0xff]   ;;  %v2566_v57 = vld [vmem:[%s3288_s3 + $0x68] sm:$0xff]  }
 0x1a8   : > { %v1111_v61 = vmax.f32 %v1089_v55, 0.0  ;;  %v2565_v55 = vld [vmem:[%s3288_s3 + $0x20] sm:$0xff]  }
 0x1a9   : > { %v1109_v63 = vmax.f32 %v1081_v59, 0.0  ;;  %v2567_v59 = vld [vmem:[%s3288_s3 + $0x28] sm:$0xff]  }
 0x1aa   : > { %v3010_v0 = vpack.c.bf16 %v1111_v61, %v1110_v60 }
 0x1ab   : > { %v3012_v1 = vpack.c.bf16 %v1109_v63, %v1108_v62  ;;  %v2568_v62 = vld [vmem:[%s3288_s3 + $0x70] sm:$0xff]  }
 0x1ad   : > { %2302 = vmatpush3.bf16.msra.mxu1 %v3012_v1  ;;  %2314 = vmatpush3.bf16.msra.mxu0 %v3012_v1 }
 0x1ae   : > { %2303 = vmatprep.subr.bf16.mxu1 %v2649_v47  ;;  %2315 = vmatprep.subr.bf16.mxu0 %v2649_v47 }
 0x1b1   : > { %2304 = vmatpush3.bf16.msra.mxu1 %v3010_v0  ;;  %2316 = vmatpush3.bf16.msra.mxu0 %v3010_v0 }
 0x1b2   : > { %2305 = vmatprep.subr.bf16.mxu1 %v2649_v47  ;;  %2317 = vmatprep.subr.bf16.mxu0 %v2649_v47 }
 0x1df   : > { %v2299_v2 = vpop.f32.mrb[4].mxu0 }
 0x1e0   : > { %v1102_v3 = vadd.f32 %v2299_v2, %v3004_v48  ;;  %v1093_v4 = vpop.f32.mrb[5].mxu0 }
 0x1e1   : > { %v1094_v5 = vadd.f32 %v3004_v48, %v1093_v4  ;;  %v2300_v7 = vpop.f32.mrb[6].mxu0 }
 0x1e2   : > { %v1105_v9 = vadd.f32 %v2300_v7, %v3004_v48  ;;  %v1096_v10 = vpop.f32.mrb[7].mxu0  ;;  %v1114_v13 = vmax.f32 %v1102_v3, 0.0 }
 0x1e3   : > { %v1097_v12 = vadd.f32 %v3004_v48, %v1096_v10  ;;  %v1112_v14 = vmax.f32 %v1094_v5, 0.0  ;;  %v2571_v10 = vld [vmem:[%s3288_s3 + $0x78] sm:$0xff]  }
 0x1e4   : > { %v1115_v6 = vmax.f32 %v1105_v9, 0.0  ;;  %v2569_v9 = vld [vmem:[%s3288_s3 + $0x30] sm:$0xff]  }
 0x1e5   : > { %v1113_v8 = vmax.f32 %v1097_v12, 0.0  ;;  %v2572_v12 = vld [vmem:[%s3288_s3 + $0x38] sm:$0xff]  }
 0x1e6   : > { %v3026_v15 = vpack.c.bf16 %v1115_v6, %v1114_v13  ;;  %v2573_v13 = vld [vmem:[%s3288_s3 + $0x88] sm:$0xff]  }
 0x1e7   : > { %v3028_v17 = vpack.c.bf16 %v1113_v8, %v1112_v14 }
 0x1e9   : > { %2306 = vmatpush3.bf16.msra.mxu1 %v3028_v17  ;;  %2318 = vmatpush3.bf16.msra.mxu0 %v3028_v17 }
 0x1ea   : > { %2307 = vmatprep.subr.bf16.mxu1 %v2649_v47  ;;  %2319 = vmatprep.subr.bf16.mxu0 %v2649_v47 }
 0x1ed   : > { %2308 = vmatpush3.bf16.msra.mxu1 %v3026_v15  ;;  %2320 = vmatpush3.bf16.msra.mxu0 %v3026_v15 }
 0x1ee   : > { %2325 = vmatprep.subr.bf16.mxu1 %v2649_v47  ;;  %2337 = vmatprep.subr.bf16.mxu0 %v2649_v47 }
 0x1f0   : > { %2310 = vmatmul.mubr.msk.bf16.vlgmr.msra.gmra.mrb[0].mxu1 %vm1127_vm12, %v2547_v18  ;;  %2322 = vmatmul.mubr.msk.bf16.vlgmr.msra.gmra.mrb[8].mxu0 %vm1127_vm12, %v2548_v19 }
 0x1f1   : > { %2326 = vmatpush3.bf16.msra.mxu1 %v3012_v1  ;;  %2338 = vmatpush3.bf16.msra.mxu0 %v3012_v1 }
 0x1f2   : > { %2327 = vmatprep.subr.bf16.mxu1 %v2649_v47  ;;  %2339 = vmatprep.subr.bf16.mxu0 %v2649_v47 }
 0x1f3   : > { %2333 = vmatprep.mubr.msk.bf16.mxu1 %vm2650_vm11, %v2649_v47  ;;  %2345 = vmatprep.mubr.msk.bf16.mxu0 %vm2650_vm11, %v2649_v47 }
 0x1f5   : > { %2328 = vmatpush3.bf16.msra.mxu1 %v3010_v0  ;;  %2340 = vmatpush3.bf16.msra.mxu0 %v3010_v0 }
 0x1f6   : > { %2329 = vmatprep.subr.bf16.mxu1 %v2649_v47  ;;  %2341 = vmatprep.subr.bf16.mxu0 %v2649_v47 }
 0x1f9   : > { %2330 = vmatpush3.bf16.msra.mxu1 %v3028_v17  ;;  %2342 = vmatpush3.bf16.msra.mxu0 %v3028_v17 }
 0x1fa   : > { %2331 = vmatprep.subr.bf16.mxu1 %v2649_v47  ;;  %2343 = vmatprep.subr.bf16.mxu0 %v2649_v47 }
 0x1fd   : > { %2332 = vmatpush3.bf16.msra.mxu1 %v3026_v15  ;;  %2344 = vmatpush3.bf16.msra.mxu0 %v3026_v15 }
 0x1fe   : > { %2349 = vmatprep.subr.bf16.mxu1 %v2649_v47  ;;  %2361 = vmatprep.subr.bf16.mxu0 %v2649_v47 }
 0x200   : > { %2334 = vmatmul.mubr.msk.bf16.vlgmr.msra.gmra.mrb[4].mxu1 %vm1127_vm12, %v2549_v20  ;;  %2346 = vmatmul.mubr.msk.bf16.vlgmr.msra.gmra.mrb[12].mxu0 %vm1127_vm12, %v2550_v21 }
 0x201   : > { %2350 = vmatpush3.bf16.msra.mxu1 %v3012_v1  ;;  %2362 = vmatpush3.bf16.msra.mxu0 %v3012_v1 }
 0x202   : > { %2351 = vmatprep.subr.bf16.mxu1 %v2649_v47  ;;  %2363 = vmatprep.subr.bf16.mxu0 %v2649_v47 }
 0x203   : > { %2357 = vmatprep.mubr.msk.bf16.mxu1 %vm2650_vm11, %v2649_v47  ;;  %2369 = vmatprep.mubr.msk.bf16.mxu0 %vm2650_vm11, %v2649_v47 }
 0x205   : > { %2352 = vmatpush3.bf16.msra.mxu1 %v3010_v0  ;;  %2364 = vmatpush3.bf16.msra.mxu0 %v3010_v0 }
 0x206   : > { %2353 = vmatprep.subr.bf16.mxu1 %v2649_v47  ;;  %2365 = vmatprep.subr.bf16.mxu0 %v2649_v47 }
 0x209   : > { %2354 = vmatpush3.bf16.msra.mxu1 %v3028_v17  ;;  %2366 = vmatpush3.bf16.msra.mxu0 %v3028_v17 }
 0x20a   : > { %2355 = vmatprep.subr.bf16.mxu1 %v2649_v47  ;;  %2367 = vmatprep.subr.bf16.mxu0 %v2649_v47 }
 0x20d   : > { %2356 = vmatpush3.bf16.msra.mxu1 %v3026_v15  ;;  %2368 = vmatpush3.bf16.msra.mxu0 %v3026_v15 }
 0x20e   : > { %2373 = vmatprep.subr.bf16.mxu1 %v2649_v47  ;;  %2385 = vmatprep.subr.bf16.mxu0 %v2649_v47 }
 0x210   : > { %2358 = vmatmul.mubr.msk.bf16.vlgmr.msra.gmra.mrb[8].mxu1 %vm1127_vm12, %v2551_v28  ;;  %2370 = vmatmul.mubr.msk.bf16.vlgmr.msra.gmra.mrb[16].mxu0 %vm1127_vm12, %v2552_v22 }
 0x211   : > { %2374 = vmatpush3.bf16.msra.mxu1 %v3012_v1  ;;  %2386 = vmatpush3.bf16.msra.mxu0 %v3012_v1 }
 0x212   : > { %2375 = vmatprep.subr.bf16.mxu1 %v2649_v47  ;;  %2387 = vmatprep.subr.bf16.mxu0 %v2649_v47 }
 0x213   : > { %2381 = vmatprep.mubr.msk.bf16.mxu1 %vm2650_vm11, %v2649_v47  ;;  %2393 = vmatprep.mubr.msk.bf16.mxu0 %vm2650_vm11, %v2649_v47 }
 0x215   : > { %2376 = vmatpush3.bf16.msra.mxu1 %v3010_v0  ;;  %2388 = vmatpush3.bf16.msra.mxu0 %v3010_v0 }
 0x216   : > { %2377 = vmatprep.subr.bf16.mxu1 %v2649_v47  ;;  %2389 = vmatprep.subr.bf16.mxu0 %v2649_v47 }
 0x219   : > { %2378 = vmatpush3.bf16.msra.mxu1 %v3028_v17  ;;  %2390 = vmatpush3.bf16.msra.mxu0 %v3028_v17 }
 0x21a   : > { %2379 = vmatprep.subr.bf16.mxu1 %v2649_v47  ;;  %2391 = vmatprep.subr.bf16.mxu0 %v2649_v47 }
 0x21d   : > { %2380 = vmatpush3.bf16.msra.mxu1 %v3026_v15  ;;  %2392 = vmatpush3.bf16.msra.mxu0 %v3026_v15 }
 0x21e   : > { %2397 = vmatprep.subr.bf16.mxu1 %v2649_v47  ;;  %2261 = vmatprep.subr.bf16.mxu0 %v2556_v35 }
 0x220   : > { %2382 = vmatmul.mubr.msk.bf16.vlgmr.msra.gmra.mrb[12].mxu1 %vm1127_vm12, %v2553_v51  ;;  %2394 = vmatmul.mubr.msk.bf16.vlgmr.msra.gmra.mrb[20].mxu0 %vm1127_vm12, %v2554_v23 }
 0x221   : > { %2398 = vmatpush3.bf16.msra.mxu1 %v3012_v1  ;;  %2405 = vmatprep.mubr.msk.bf16.mxu1 %vm2650_vm11, %v2649_v47 }
 0x222   : > { %2399 = vmatprep.subr.bf16.mxu1 %v2649_v47  ;;  %2262 = vmatpush3.bf16.msra.mxu0 %v2557_v36 }
 0x223   : > { %2263 = vmatprep.subr.bf16.mxu0 %v2558_v11 }
 0x225   : > { %2400 = vmatpush3.bf16.msra.mxu1 %v3010_v0 }
 0x226   : > { %2401 = vmatprep.subr.bf16.mxu1 %v2649_v47  ;;  %2264 = vmatpush3.bf16.msra.mxu0 %v2559_v37 }
 0x227   : > { %2265 = vmatprep.subr.bf16.mxu0 %v2560_v31 }
 0x229   : > { %2402 = vmatpush3.bf16.msra.mxu1 %v3028_v17 }
 0x22a   : > { %2403 = vmatprep.subr.bf16.mxu1 %v2649_v47  ;;  %2266 = vmatpush3.bf16.msra.mxu0 %v2561_v49 }
 0x22b   : > { %2267 = vmatprep.subr.bf16.mxu0 %v2562_v50 }
 0x22d   : > { %2404 = vmatpush3.bf16.msra.mxu1 %v3026_v15 }
 0x22e   : > { %2409 = vmatprep.subr.bf16.mxu1 %v2649_v47  ;;  %2268 = vmatpush3.bf16.msra.mxu0 %v2563_v52 }
 0x22f   : > { %2269 = vmatprep.subr.bf16.mxu0 %v2564_v53 }
 0x230   : > { %2406 = vmatmul.mubr.msk.bf16.vlgmr.msra.gmra.mrb[16].mxu1 %vm1127_vm12, %v2555_v24 }
 0x231   : > { %2413 = vmatprep.mubr.msk.bf16.mxu1 %vm2650_vm11, %v2649_v47  ;;  %2410 = vmatpush3.bf16.msra.mxu1 %v2570_v54 }
 0x232   : > { %2411 = vmatprep.subr.bf16.mxu1 %v2649_v47  ;;  %2270 = vmatpush3.bf16.msra.mxu0 %v2565_v55 }
 0x233   : > { %2271 = vmatprep.subr.bf16.mxu0 %v2566_v57 }
 0x235   : > { %2412 = vmatpush3.bf16.msra.mxu1 %v2573_v13 }
 0x236   : > { %2272 = vmatpush3.bf16.msra.mxu0 %v2567_v59  ;;  %2417 = vmatprep.subr.bf16.mxu1 %v2649_v47 }
 0x237   : > { %2273 = vmatprep.subr.bf16.mxu0 %v2568_v62 }
 0x23a   : > { %2274 = vmatpush3.bf16.msra.mxu0 %v2569_v9 }
 0x23b   : > { %2275 = vmatprep.subr.bf16.mxu0 %v2571_v10 }
 0x23e   : > { %2276 = vmatpush3.bf16.msra.mxu0 %v2572_v12 }
 0x2c3   : > { %v3145_v25 = vpop.f32.mrb[0].mxu1  ;;  %v1218_v26 = vpop.f32.mrb[8].mxu0 }
 0x2c4   : > { %v2311_v27 = vpop.f32.mrb[1].mxu1  ;;  %v2323_v29 = vpop.f32.mrb[9].mxu0 }
 0x2c5   : > { %v3147_v56 = vpop.f32.mrb[2].mxu1  ;;  %v1221_v30 = vpop.f32.mrb[10].mxu0 }
 0x2c6   : > { %v1172_v32 = vpack.c.bf16 %v3147_v56, %v3145_v25  ;;  %v1225_v33 = vpack.c.bf16 %v1221_v30, %v1218_v26  ;;  %v2312_v58 = vpop.f32.mrb[3].mxu1  ;;  %v2324_v34 = vpop.f32.mrb[11].mxu0  ;;  %v2575_v25 = vld [vmem:[%s3289_s4 + $0x8] sm:$0xff]  }
 0x2c8   : > { %1598 = vrot.lane.b32.xlu1 %v1225_v33, %s2651_s16 }
 0x2d3   : > { %v1271_v38 = vpop.f32.mrb[4].mxu1  ;;  %v1324_v16 = vpop.f32.mrb[12].mxu0 }
 0x2d4   : > { %v2335_v39 = vpop.f32.mrb[5].mxu1  ;;  %v2347_v40 = vpop.f32.mrb[13].mxu0 }
 0x2d5   : > { %v1274_v41 = vpop.f32.mrb[6].mxu1  ;;  %v1327_v42 = vpop.f32.mrb[14].mxu0 }
 0x2d6   : > { %v1278_v43 = vpack.c.bf16 %v1274_v41, %v1271_v38  ;;  %v2336_v44 = vpop.f32.mrb[7].mxu1  ;;  %v1331_v45 = vpack.c.bf16 %v1327_v42, %v1324_v16  ;;  %v2348_v46 = vpop.f32.mrb[15].mxu0  ;;  %v2574_v16 = vld [vmem:[%s3289_s4] sm:$0xff]  }
 0x2d8   : > { %1601 = vrot.lane.b32.xlu1 %v1278_v43, %s2652_s14 }
 0x2dc   : > { %1604 = vrot.lane.b32.xlu1 %v1331_v45, %s2653_s28 }
 0x2e0   : > { %1884 = vrot.lane.b32.xlu1 %v3004_v48, %s2652_s14 }
 0x2e3   : > { %v1377_v60 = vpop.f32.mrb[8].mxu1  ;;  %v1430_v61 = vpop.f32.mrb[16].mxu0 }
 0x2e4   : > { %v2359_v63 = vpop.f32.mrb[9].mxu1  ;;  %v2371_v0 = vpop.f32.mrb[17].mxu0 }
 0x2e5   : > { %v1380_v1 = vpop.f32.mrb[10].mxu1  ;;  %v1433_v2 = vpop.f32.mrb[18].mxu0 }
 0x2e6   : > { %v1384_v3 = vpack.c.bf16 %v1380_v1, %v1377_v60  ;;  %v1437_v4 = vpack.c.bf16 %v1433_v2, %v1430_v61  ;;  %v2360_v5 = vpop.f32.mrb[11].mxu1  ;;  %v2372_v7 = vpop.f32.mrb[19].mxu0 }
 0x2e8   : > { %1607 = vrot.lane.b32.xlu0 %v1437_v4, %s2651_s16  ;;  %s2582_s16 = scalar_lea.vmem %s2581_s13, 512 }
 0x2e9   : > { %p2584_p1 = scmp.lt.s32.totalorder %s2582_s16, %s2576_s11 }
 0x2eb   : > { %p2585_p2 = por %p2584_p1, %p2583_p0 }
 0x2ed   : > { %p2586_p3 = pnand %p2585_p2, %p2579_p13 }
 0x2f3   : > { %v1483_v6 = vpop.f32.mrb[12].mxu1  ;;  %v1536_v14 = vpop.f32.mrb[20].mxu0 }
 0x2f4   : > { %v2383_v8 = vpop.f32.mrb[13].mxu1  ;;  %v2395_v15 = vpop.f32.mrb[21].mxu0 }
 0x2f5   : > { %v1486_v17 = vpop.f32.mrb[14].mxu1  ;;  %v1539_v18 = vpop.f32.mrb[22].mxu0 }
 0x2f6   : > { %v1490_v19 = vpack.c.bf16 %v1486_v17, %v1483_v6  ;;  %v2384_v20 = vpop.f32.mrb[15].mxu1  ;;  %v1543_v21 = vpack.c.bf16 %v1539_v18, %v1536_v14  ;;  %v2396_v28 = vpop.f32.mrb[23].mxu0 }
 0x2f8   : > { %1610 = vrot.lane.b32.xlu0 %v1490_v19, %s2652_s14 }
 0x2fc   : > { %1613 = vrot.lane.b32.xlu0 %v1543_v21, %s2653_s28 }
 0x300   : > { %1777 = vrot.lane.b32.xlu0 %v3004_v48, %s2653_s28 }
 0x303   : > { %v1589_v22 = vpop.f32.mrb[16].mxu1 }
 0x304   : > { %v2407_v51 = vpop.f32.mrb[17].mxu1 }
 0x305   : > { %v1592_v23 = vpop.f32.mrb[18].mxu1 }
 0x306   : > { %v1596_v24 = vpack.c.bf16 %v1592_v23, %v1589_v22  ;;  %v2408_v26 = vpop.f32.mrb[19].mxu1 }
 0x308   : > { %2414 = vmatmul.mubr.msk.bf16.vlgmr.msra.gmra.mrb[20].mxu1 %vm1615_vm13, %v1596_v24 }
 0x309   : > { %2421 = vmatprep.mubr.msk.bf16.mxu1 %vm2650_vm11, %v2649_v47  ;;  %2418 = vmatpush3.bf16.msra.mxu1 %v2574_v16 }
 0x30a   : > { %2419 = vmatprep.subr.bf16.mxu1 %v2649_v47 }
 0x30d   : > { %2420 = vmatpush3.bf16.msra.mxu1 %v2575_v25 }
 0x33a   : > { %v1599_v27 = vpop.permute.xlu1 %1598 }
 0x33b   : > { %v1618_v48 = vsel %vm1615_vm13, %v1172_v32, %v1599_v27 }
 0x34a   : > { %v1602_v30 = vpop.permute.xlu1 %1601 }
 0x34b   : > { %v1620_v11 = vsel %vm1127_vm12, %v1618_v48, %v1602_v30 }
 0x34e   : > { %v1605_v58 = vpop.permute.xlu1 %1604 }
 0x34f   : > { %v1623_v38 = vsel %vm1621_vm14, %v1620_v11, %v1605_v58 }
 0x352   : > { %v1885_v57 = vpop.permute.xlu1 %1884 }
 0x35a   : > { %v1608_v29 = vpop.permute.xlu0 %1607 }
 0x35b   : > { %v1627_v34 = vsel %vm1615_vm13, %v1384_v3, %v1608_v29 }
 0x36a   : > { %v1611_v33 = vpop.permute.xlu0 %1610 }
 0x36b   : > { %v1629_v35 = vsel %vm1127_vm12, %v1627_v34, %v1611_v33 }
 0x36e   : > { %v1614_v36 = vpop.permute.xlu0 %1613 }
 0x36f   : > { %v1631_v37 = vsel %vm1621_vm14, %v1629_v35, %v1614_v36 }
 0x370   : > { %1815 = vmatprep.mubr.bf16.mxu0 %v1631_v37 }
 0x371   : > { %1816 = vmatmul.mubr.bf16.vlgmr.msra.gmra.mrb[24].mxu0 %v1623_v38 }
 0x372   : > { %v1778_v42 = vpop.permute.xlu0 %1777 }
 0x3db   : > { %v1858_v56 = vpop.f32.mrb[20].mxu1 }
 0x3dc   : > { %v2415_v32 = vpop.f32.mrb[21].mxu1 }
 0x3dd   : > { %v1861_v31 = vpop.f32.mrb[22].mxu1 }
 0x3de   : > { %v2416_v39 = vpop.f32.mrb[23].mxu1 }
 0x444   : > { %v2277_v40 = vpop.f32.mrb[24].mxu0 }
 0x445   : > { %v2278_v41 = vpop.f32.mrb[25].mxu0 }
 0x446   : > { %v2279_v43 = vadd.f32 %v2278_v41, %v2277_v40  ;;  %v2280_v44 = vpop.f32.mrb[26].mxu0 }
 0x447   : > { %v2281_v45 = vpop.f32.mrb[27].mxu0 }
 0x448   : > { %v2282_v46 = vadd.f32 %v2281_v45, %v2280_v44  ;;  %v1818_v49 = vadd.f32 %v2279_v43, %v1778_v42 }
 0x44a   : > { %v1821_v47 = vadd.f32 %v2282_v46, %v1778_v42  ;;  %v1859_v50 = vadd.f32 %v1858_v56, %v1818_v49 }
 0x44c   : > { %v1862_v52 = vadd.f32 %v1861_v31, %v1821_v47  ;;  %v1865_v53 = vmax.f32 %v1859_v50, 0.0 }
 0x44e   : > { %v1866_v54 = vmax.f32 %v1862_v52, 0.0 }
 0x450   : > { %v1867_v55 = vpack.c.bf16 %v1866_v54, %v1865_v53 }
 0x452   : > { %2422 = vmatmul.mubr.msk.bf16.vlgmr.msra.gmra.mrb[24].mxu1 %vm1615_vm13, %v1867_v55 }
 0x525   : > { %v1924_v59 = vpop.f32.mrb[24].mxu1 }
 0x526   : > { %v1925_v60 = vadd.f32 %v1924_v59, %v1885_v57  ;;  %v2423_v61 = vpop.f32.mrb[25].mxu1 }
 0x527   : > { %v1927_v62 = vpop.f32.mrb[26].mxu1 }
 0x528   : > { %1932 = vst.msk [vmem:[%s247_s19] sm:$0xff] %vm1931_vm15, %v1925_v60  ;;  %v1928_v63 = vadd.f32 %v1927_v62, %v1885_v57  ;;  %v2424_v0 = vpop.f32.mrb[27].mxu1 }
 0x52a   : > { %1933 = vst.msk [vmem:[%s247_s19 + $0x8] sm:$0xff] %vm1931_vm15, %v1928_v63 }
 0x52b   : > { %2589 = shalt.err (!%p2586_p3)
}
 0x52c   : > { %s2590_s14 = scalar_lea.hbm %s3242_s10, 256  ;;  %s2594_s17 = scalar_lea.hbm %s3291_s6, 512 }
 0x52d   : > { %p2591_p4 = scmp.ne.s32.totalorder %s3242_s10, %s2590_s14  ;;  %p2595_p9 = scmp.lt.u32.totalorder %s3242_s10, %s3291_s6 }
 0x52e   : > { %p2596_p10 = scmp.lt.u32.totalorder %s2594_s17, %s2590_s14  ;;  %p2598_p12 = scmp.lt.u32.totalorder %s2590_s14, %s3242_s10 }
 0x52f   : > { %p2592_p7 = pnand %p2591_p4, %p2730_p5 }
 0x530   : > { %p2597_p11 = por %p2596_p10, %p2595_p9 }
 0x531   : > { %p2593_p8 = pneg %p2592_p7 }
 0x532   : > { %p2599_p13 = por %p2598_p12, %p2597_p11 }
 0x534   : > { %p2600_p0 = pnand %p2599_p13, %p2593_p8 }
 0x536   : > { %2603 = shalt.err (!%p2600_p0)
}
 0x537   : > { %s2655_s26 = smov 128   ;;  %s2656_s29 = smov 8  }
 0x538   : > { %2426 = dma.vmem_to_hbm [thread:$0]  (%p2730_p5), %s3237_s20, 256, %s3242_s10, %s3244_s25, %s2655_s26, %s2655_s26, %s2656_s29  }
 0x539 PF: > { %p2432_p1 = scmp.ge.s32.totalorder %s2638_s24, 2  ;;  %s1963_s9 = sand.u32 1, %s2626_s21  }
 0x53a   : > { %s1964_s11 = scalar_lea.sflag [#allocation3], %s1963_s9 }
 0x53b   : > { %p2429_p2 = pnand %p2432_p1, %p2734_p6 }
 0x53d   : > { %2621 = dma.done.wait (!%p2429_p2), %s1964_s11, 256  }
 0x53e   : > { %2623 = vsyncadd (!%p2429_p2), %s1964_s11, 4294967040  ;;  %p16_p3 = scmp.ge.s32.totalorder %s2717_s27, 4   ;;  %s3294_s21 = smov %s2630_s22 }
 0x53f   : > { %s3295_s22 = smov %s2634_s23  ;;  %s3296_s23 = smov %s2728_s30 }
 0x540   : > { %s3297_s24 = smov %s2717_s27  ;;  %18 = sbr.rel (!%p16_p3) target bundleno = 3 (0x3), region = 92 }
 0x547   :  { %1969 = vsyncpa [#allocation3], 1 }
 0x548   :  { %1971 = vsyncpa [#allocation3 + $0x1], 1 }

</bundles_post_ra>
